<compile_context>
chip_gen: v5e
topology: v5e:2x2
jax: 0.10.0
libtpu: 0.0.40
codegen_flags: <defaults>
</compile_context>

<pallas_src>
import jax
import jax.numpy as jnp
from jax.experimental import pallas as pl
from jax.experimental.pallas import tpu as pltpu


def _round_up(x, m):
    return (x + m - 1) // m * m


def _make_mlp_kernel(num_layers, skips):
    """Build the fused-MLP kernel body for a given layer structure."""
    skips = tuple(skips)

    def kernel(x_ref, wx_ref, wh_ref, b_ref, wfin_ref, bfin_ref, o_ref):
        # x_ref:    (tm, c_in_pad)            bf16
        # wx_ref:   (1+n_skip, c_in_pad, W)   bf16   (layer-0 weight + skip w_x)
        # wh_ref:   (max(D-1,1), W, W)        bf16   ((W,W) hidden weights / skip w_h)
        # b_ref:    (D, 1, W)                 f32
        # wfin_ref: (W, out_pad)              bf16
        # bfin_ref: (1, out_pad)              f32
        x = x_ref[...]                                      # bf16 activations for x-side dots

        # layer 0
        acc = jnp.dot(x, wx_ref[0], preferred_element_type=jnp.float32)
        h = jnp.maximum(acc + b_ref[0], 0.0)                # f32

        x_idx = 1
        wh_idx = 0
        for i in range(1, num_layers):
            acc = jnp.dot(h.astype(jnp.bfloat16), wh_ref[wh_idx],
                          preferred_element_type=jnp.float32)
            wh_idx += 1
            if i in skips:
                # cat([x, h]) @ W == x @ W[:c_in] + h @ W[c_in:]  (split wrapper-side)
                acc = acc + jnp.dot(x, wx_ref[x_idx],
                                    preferred_element_type=jnp.float32)
                x_idx += 1
            h = jnp.maximum(acc + b_ref[i], 0.0)

        # final linear (no activation; final_act=False)
        out = jnp.dot(h.astype(jnp.bfloat16), wfin_ref[...],
                      preferred_element_type=jnp.float32) + bfin_ref[...]
        o_ref[...] = out.astype(o_ref.dtype)

    return kernel


def cond_mlp_forward(feat, inst_id, embedding, weights, biases,
                     skips=(4,), row_tile=2048):
    """Pallas CondMLP forward.

    feat:      (M, ..., in_channels) float32
    inst_id:   (M,) int32, or None (use mean embedding)
    embedding: (num_inst, inst_channels) float32
    weights:   list of D+1 weight matrices, layer i has shape (K_i, W) where
               K_i = in_ch+inst_ch (i==0), W+in_ch+inst_ch (i in skips), else W;
               last entry is the final linear (W, out_channels).
    biases:    list of D+1 bias vectors.
    """
    num_layers = len(weights) - 1
    inst_channels = embedding.shape[1]
    lead = feat.shape[:-1]

    # ---- condition code: embedding lookup + broadcast + concat (wrapper-side plumbing) ----
    if inst_id is None:
        # TODO(synk): lab4d's InstEmbedding may apply a learned basis/beta scaling;
        # modeled here as a plain embedding table (mean embedding for inst_id=None).
        inst_code = jnp.mean(embedding, axis=0)
        inst_code = jnp.broadcast_to(inst_code, lead + (inst_channels,))
    else:
        inst_code = jnp.take(embedding, inst_id, axis=0)            # (M, inst_ch)
        inst_code = inst_code.reshape(
            (inst_code.shape[0],) + (1,) * (feat.ndim - 2) + (inst_channels,))
        inst_code = jnp.broadcast_to(inst_code, lead + (inst_channels,))
    x = jnp.concatenate([feat, inst_code], axis=-1)                 # (..., c_in)
    c_in = x.shape[-1]
    if c_in == 0:
        return x

    out_channels = weights[-1].shape[1]
    W = weights[0].shape[1]
    skips_used = tuple(sorted(s for s in set(skips) if 0 < s < num_layers))

    # ---- lane-dense padding of input / output channel dims ----
    c_in_pad = max(_round_up(c_in, 128), 128)
    out_pad = max(_round_up(out_channels, 128), 128)

    # ---- stacked, bf16 weight operands (built once, wrapper-side) ----
    def pad_rows(w):  # (c_in, W) -> (c_in_pad, W), zero rows for padded lanes of x
        return jnp.zeros((c_in_pad, W), w.dtype).at[:c_in].set(w)

    wx_list = [pad_rows(weights[0])]        # x-side weights: layer 0 + every skip's w_x
    wh_list = []                            # (W, W) weights: hidden layers / skip w_h
    for i in range(1, num_layers):
        if i in skips_used:
            wx_list.append(pad_rows(weights[i][:c_in]))
            wh_list.append(weights[i][c_in:])
        else:
            wh_list.append(weights[i])
    wx_stack = jnp.stack(wx_list).astype(jnp.bfloat16)              # (1+n_skip, c_in_pad, W)
    if wh_list:
        wh_stack = jnp.stack(wh_list).astype(jnp.bfloat16)          # (D-1, W, W)
    else:
        wh_stack = jnp.zeros((1, W, W), jnp.bfloat16)               # dummy (unused when D==1)
    b_stack = jnp.stack([biases[i] for i in range(num_layers)]
                        ).astype(jnp.float32)[:, None, :]           # (D, 1, W) f32

    w_fin = jnp.zeros((W, out_pad), jnp.float32).at[:, :out_channels].set(weights[-1])
    w_fin = w_fin.astype(jnp.bfloat16)                              # (W, out_pad)
    b_fin = jnp.zeros((1, out_pad), jnp.float32).at[0, :out_channels].set(biases[-1])

    # ---- flatten rows, pad, choose row tile (>=2 blocks for v7x dual-TC when large) ----
    x2d = x.reshape(-1, c_in)
    n = x2d.shape[0]
    if n <= 256:
        tm = _round_up(n, 16)               # tiny problem: single block
        n_pad = tm
    else:
        tm = min(row_tile, _round_up(pl.cdiv(n, 2), 16))
        n_pad = _round_up(n, tm)
    x2d = jnp.pad(x2d, ((0, n_pad - n), (0, c_in_pad - c_in))).astype(jnp.bfloat16)
    grid = (n_pad // tm,)

    kernel = _make_mlp_kernel(num_layers, skips_used)

    def const_spec(shape):  # weights: constant block index -> stay VMEM-resident
        return pl.BlockSpec(shape, lambda i: (0,) * len(shape))

    out2d = pl.pallas_call(
        kernel,
        out_shape=jax.ShapeDtypeStruct((n_pad, out_pad), feat.dtype),
        grid_spec=pltpu.PrefetchScalarGridSpec(
            num_scalar_prefetch=0,
            grid=grid,
            in_specs=[pl.BlockSpec((tm, c_in_pad), lambda i: (i, 0)),
                      const_spec(wx_stack.shape),
                      const_spec(wh_stack.shape),
                      const_spec(b_stack.shape),
                      const_spec(w_fin.shape),
                      const_spec(b_fin.shape)],
            out_specs=pl.BlockSpec((tm, out_pad), lambda i: (i, 0)),
        ),
        compiler_params=pltpu.CompilerParams(
            dimension_semantics=("parallel",),
            vmem_limit_bytes=48 * 1024 * 1024,
        ),
    )(x2d, wx_stack, wh_stack, b_stack, w_fin, b_fin)

    out = out2d[:n, :out_channels]
    return out.reshape(lead + (out_channels,))


# ---------------- pure-JAX reference (mirrors the torch forward, f32) ----------------
def cond_mlp_ref(feat, inst_id, embedding, weights, biases, skips=(4,)):
    inst_channels = embedding.shape[1]
    lead = feat.shape[:-1]
    if inst_id is None:
        inst_code = jnp.broadcast_to(jnp.mean(embedding, 0), lead + (inst_channels,))
    else:
        inst_code = jnp.take(embedding, inst_id, axis=0)
        inst_code = inst_code.reshape(
            (inst_code.shape[0],) + (1,) * (feat.ndim - 2) + (inst_channels,))
        inst_code = jnp.broadcast_to(inst_code, lead + (inst_channels,))
    x = jnp.concatenate([feat, inst_code], -1)
    out = x
    D = len(weights) - 1
    for i in range(D):
        if i in skips:
            out = jnp.concatenate([x, out], -1)
        out = jnp.maximum(out @ weights[i] + biases[i], 0.0)
    return out @ weights[-1] + biases[-1]


if __name__ == "__main__":
    # CondMLP default architecture, small batch.
    num_inst, D, W = 3, 8, 256
    in_channels, inst_channels, out_channels = 63, 32, 3
    skips = (4,)
    M, S = 2, 8                              # batch=2, seq=8 rows per batch

    key = jax.random.PRNGKey(0)
    keys = jax.random.split(key, 2 * (D + 1) + 3)

    c_in = in_channels + inst_channels
    dims_in = []
    for i in range(D):
        if i == 0:
            dims_in.append(c_in)
        elif i in skips:
            dims_in.append(W + c_in)
        else:
            dims_in.append(W)
    dims_in.append(W)                        # final layer input
    dims_out = [W] * D + [out_channels]

    weights, biases = [], []
    for i, (di, do) in enumerate(zip(dims_in, dims_out)):
        bound = 1.0 / jnp.sqrt(di)           # torch nn.Linear default init
        weights.append(jax.random.uniform(keys[2 * i], (di, do),
                                          minval=-bound, maxval=bound,
                                          dtype=jnp.float32))
        biases.append(jax.random.uniform(keys[2 * i + 1], (do,),
                                         minval=-bound, maxval=bound,
                                         dtype=jnp.float32))

    embedding = jax.random.normal(keys[-3], (num_inst, inst_channels),
                                  dtype=jnp.float32) * 0.1
    feat = jax.random.normal(keys[-2], (M, S, in_channels), dtype=jnp.float32)
    inst_id = jnp.array([0, 2], dtype=jnp.int32)

    # bf16 matmuls with f32 accumulation vs f32 reference -> relaxed tolerance.
    tol = 1e-2

    out = cond_mlp_forward(feat, inst_id, embedding, weights, biases, skips=skips)
    out = jax.block_until_ready(out)
    ref = cond_mlp_ref(feat, inst_id, embedding, weights, biases, skips=skips)
    assert out.shape == (M, S, out_channels) and out.dtype == feat.dtype
    assert jnp.allclose(out, ref, atol=tol, rtol=tol), \
        float(jnp.max(jnp.abs(out - ref)))

    # inst_id=None path (mean embedding)
    out_none = cond_mlp_forward(feat, None, embedding, weights, biases, skips=skips)
    out_none = jax.block_until_ready(out_none)
    ref_none = cond_mlp_ref(feat, None, embedding, weights, biases, skips=skips)
    assert jnp.allclose(out_none, ref_none, atol=tol, rtol=tol), \
        float(jnp.max(jnp.abs(out_none - ref_none)))

    print("KERNEL_OK")
</pallas_src>

<mosaic_0001>
module attributes {stable_mosaic.version = 11 : i64} {
  func.func @kernel(%arg0: i32, %arg1: memref<16x128xbf16, #tpu.memory_space<vmem>>, %arg2: memref<2x128x256xbf16, #tpu.memory_space<vmem>>, %arg3: memref<7x256x256xbf16, #tpu.memory_space<vmem>>, %arg4: memref<8x1x256xf32, #tpu.memory_space<vmem>>, %arg5: memref<256x128xbf16, #tpu.memory_space<vmem>>, %arg6: memref<1x128xf32, #tpu.memory_space<vmem>>, %arg7: memref<16x128xf32, #tpu.memory_space<vmem>>) attributes {dimension_semantics = [#tpu.dimension_semantics<parallel>], iteration_bounds = array<i64: 1>, scalar_prefetch = 0 : i64, scratch_operands = 0 : i64, tpu.core_type = #tpu.core_type<tc>, window_params = [{transform_indices = @transform_0, window_bounds = array<i64: 16, 128>}, {pipeline_mode = #tpu.pipeline_mode<synchronous>, transform_indices = @transform_1, window_bounds = array<i64: 2, 128, 256>}, {pipeline_mode = #tpu.pipeline_mode<synchronous>, transform_indices = @transform_2, window_bounds = array<i64: 7, 256, 256>}, {pipeline_mode = #tpu.pipeline_mode<synchronous>, transform_indices = @transform_3, window_bounds = array<i64: 8, 1, 256>}, {pipeline_mode = #tpu.pipeline_mode<synchronous>, transform_indices = @transform_4, window_bounds = array<i64: 256, 128>}, {pipeline_mode = #tpu.pipeline_mode<synchronous>, transform_indices = @transform_5, window_bounds = array<i64: 1, 128>}, {transform_indices = @transform_6, window_bounds = array<i64: 16, 128>}]} {
    %c0 = arith.constant 0 : index
    %c0_0 = arith.constant 0 : index
    %0 = vector.load %arg1[%c0, %c0_0] : memref<16x128xbf16, #tpu.memory_space<vmem>>, vector<16x128xbf16>
    %c0_1 = arith.constant 0 : index
    %c0_2 = arith.constant 0 : index
    %c0_3 = arith.constant 0 : index
    %1 = vector.load %arg2[%c0_1, %c0_2, %c0_3] : memref<2x128x256xbf16, #tpu.memory_space<vmem>>, vector<1x128x256xbf16>
    %2 = vector.shape_cast %1 : vector<1x128x256xbf16> to vector<128x256xbf16>
    %cst = arith.constant dense<0.000000e+00> : vector<16x256xf32>
    %3 = tpu.matmul %0, %2, %cst {dimension_numbers = #tpu.dot_dimension_numbers<[1], [0], [0], [1], [0, 0, 1, 1], [], []>} : vector<16x128xbf16>, vector<128x256xbf16>, vector<16x256xf32> -> vector<16x256xf32>
    %c0_4 = arith.constant 0 : index
    %c0_5 = arith.constant 0 : index
    %c0_6 = arith.constant 0 : index
    %4 = vector.load %arg4[%c0_4, %c0_5, %c0_6] : memref<8x1x256xf32, #tpu.memory_space<vmem>>, vector<1x1x256xf32>
    %5 = vector.shape_cast %4 : vector<1x1x256xf32> to vector<1x256xf32>
    %6 = vector.broadcast %5 : vector<1x256xf32> to vector<16x256xf32>
    %7 = arith.addf %3, %6 : vector<16x256xf32>
    %cst_7 = arith.constant 0.000000e+00 : f32
    %8 = vector.broadcast %cst_7 : f32 to vector<16x256xf32>
    %9 = arith.maximumf %7, %8 : vector<16x256xf32>
    %10 = arith.truncf %9 : vector<16x256xf32> to vector<16x256xbf16>
    %c0_8 = arith.constant 0 : index
    %c0_9 = arith.constant 0 : index
    %c0_10 = arith.constant 0 : index
    %11 = vector.load %arg3[%c0_8, %c0_9, %c0_10] : memref<7x256x256xbf16, #tpu.memory_space<vmem>>, vector<1x256x256xbf16>
    %12 = vector.shape_cast %11 : vector<1x256x256xbf16> to vector<256x256xbf16>
    %cst_11 = arith.constant dense<0.000000e+00> : vector<16x256xf32>
    %13 = tpu.matmul %10, %12, %cst_11 {dimension_numbers = #tpu.dot_dimension_numbers<[1], [0], [0], [1], [0, 0, 1, 1], [], []>} : vector<16x256xbf16>, vector<256x256xbf16>, vector<16x256xf32> -> vector<16x256xf32>
    %c1 = arith.constant 1 : index
    %c0_12 = arith.constant 0 : index
    %c0_13 = arith.constant 0 : index
    %14 = vector.load %arg4[%c1, %c0_12, %c0_13] : memref<8x1x256xf32, #tpu.memory_space<vmem>>, vector<1x1x256xf32>
    %15 = vector.shape_cast %14 : vector<1x1x256xf32> to vector<1x256xf32>
    %16 = vector.broadcast %15 : vector<1x256xf32> to vector<16x256xf32>
    %17 = arith.addf %13, %16 : vector<16x256xf32>
    %cst_14 = arith.constant 0.000000e+00 : f32
    %18 = vector.broadcast %cst_14 : f32 to vector<16x256xf32>
    %19 = arith.maximumf %17, %18 : vector<16x256xf32>
    %20 = arith.truncf %19 : vector<16x256xf32> to vector<16x256xbf16>
    %c1_15 = arith.constant 1 : index
    %c0_16 = arith.constant 0 : index
    %c0_17 = arith.constant 0 : index
    %21 = vector.load %arg3[%c1_15, %c0_16, %c0_17] : memref<7x256x256xbf16, #tpu.memory_space<vmem>>, vector<1x256x256xbf16>
    %22 = vector.shape_cast %21 : vector<1x256x256xbf16> to vector<256x256xbf16>
    %cst_18 = arith.constant dense<0.000000e+00> : vector<16x256xf32>
    %23 = tpu.matmul %20, %22, %cst_18 {dimension_numbers = #tpu.dot_dimension_numbers<[1], [0], [0], [1], [0, 0, 1, 1], [], []>} : vector<16x256xbf16>, vector<256x256xbf16>, vector<16x256xf32> -> vector<16x256xf32>
    %c2 = arith.constant 2 : index
    %c0_19 = arith.constant 0 : index
    %c0_20 = arith.constant 0 : index
    %24 = vector.load %arg4[%c2, %c0_19, %c0_20] : memref<8x1x256xf32, #tpu.memory_space<vmem>>, vector<1x1x256xf32>
    %25 = vector.shape_cast %24 : vector<1x1x256xf32> to vector<1x256xf32>
    %26 = vector.broadcast %25 : vector<1x256xf32> to vector<16x256xf32>
    %27 = arith.addf %23, %26 : vector<16x256xf32>
    %cst_21 = arith.constant 0.000000e+00 : f32
    %28 = vector.broadcast %cst_21 : f32 to vector<16x256xf32>
    %29 = arith.maximumf %27, %28 : vector<16x256xf32>
    %30 = arith.truncf %29 : vector<16x256xf32> to vector<16x256xbf16>
    %c2_22 = arith.constant 2 : index
    %c0_23 = arith.constant 0 : index
    %c0_24 = arith.constant 0 : index
    %31 = vector.load %arg3[%c2_22, %c0_23, %c0_24] : memref<7x256x256xbf16, #tpu.memory_space<vmem>>, vector<1x256x256xbf16>
    %32 = vector.shape_cast %31 : vector<1x256x256xbf16> to vector<256x256xbf16>
    %cst_25 = arith.constant dense<0.000000e+00> : vector<16x256xf32>
    %33 = tpu.matmul %30, %32, %cst_25 {dimension_numbers = #tpu.dot_dimension_numbers<[1], [0], [0], [1], [0, 0, 1, 1], [], []>} : vector<16x256xbf16>, vector<256x256xbf16>, vector<16x256xf32> -> vector<16x256xf32>
    %c3 = arith.constant 3 : index
    %c0_26 = arith.constant 0 : index
    %c0_27 = arith.constant 0 : index
    %34 = vector.load %arg4[%c3, %c0_26, %c0_27] : memref<8x1x256xf32, #tpu.memory_space<vmem>>, vector<1x1x256xf32>
    %35 = vector.shape_cast %34 : vector<1x1x256xf32> to vector<1x256xf32>
    %36 = vector.broadcast %35 : vector<1x256xf32> to vector<16x256xf32>
    %37 = arith.addf %33, %36 : vector<16x256xf32>
    %cst_28 = arith.constant 0.000000e+00 : f32
    %38 = vector.broadcast %cst_28 : f32 to vector<16x256xf32>
    %39 = arith.maximumf %37, %38 : vector<16x256xf32>
    %40 = arith.truncf %39 : vector<16x256xf32> to vector<16x256xbf16>
    %c3_29 = arith.constant 3 : index
    %c0_30 = arith.constant 0 : index
    %c0_31 = arith.constant 0 : index
    %41 = vector.load %arg3[%c3_29, %c0_30, %c0_31] : memref<7x256x256xbf16, #tpu.memory_space<vmem>>, vector<1x256x256xbf16>
    %42 = vector.shape_cast %41 : vector<1x256x256xbf16> to vector<256x256xbf16>
    %cst_32 = arith.constant dense<0.000000e+00> : vector<16x256xf32>
    %43 = tpu.matmul %40, %42, %cst_32 {dimension_numbers = #tpu.dot_dimension_numbers<[1], [0], [0], [1], [0, 0, 1, 1], [], []>} : vector<16x256xbf16>, vector<256x256xbf16>, vector<16x256xf32> -> vector<16x256xf32>
    %c1_33 = arith.constant 1 : index
    %c0_34 = arith.constant 0 : index
    %c0_35 = arith.constant 0 : index
    %44 = vector.load %arg2[%c1_33, %c0_34, %c0_35] : memref<2x128x256xbf16, #tpu.memory_space<vmem>>, vector<1x128x256xbf16>
    %45 = vector.shape_cast %44 : vector<1x128x256xbf16> to vector<128x256xbf16>
    %cst_36 = arith.constant dense<0.000000e+00> : vector<16x256xf32>
    %46 = tpu.matmul %0, %45, %cst_36 {dimension_numbers = #tpu.dot_dimension_numbers<[1], [0], [0], [1], [0, 0, 1, 1], [], []>} : vector<16x128xbf16>, vector<128x256xbf16>, vector<16x256xf32> -> vector<16x256xf32>
    %47 = arith.addf %43, %46 : vector<16x256xf32>
    %c4 = arith.constant 4 : index
    %c0_37 = arith.constant 0 : index
    %c0_38 = arith.constant 0 : index
    %48 = vector.load %arg4[%c4, %c0_37, %c0_38] : memref<8x1x256xf32, #tpu.memory_space<vmem>>, vector<1x1x256xf32>
    %49 = vector.shape_cast %48 : vector<1x1x256xf32> to vector<1x256xf32>
    %50 = vector.broadcast %49 : vector<1x256xf32> to vector<16x256xf32>
    %51 = arith.addf %47, %50 : vector<16x256xf32>
    %cst_39 = arith.constant 0.000000e+00 : f32
    %52 = vector.broadcast %cst_39 : f32 to vector<16x256xf32>
    %53 = arith.maximumf %51, %52 : vector<16x256xf32>
    %54 = arith.truncf %53 : vector<16x256xf32> to vector<16x256xbf16>
    %c4_40 = arith.constant 4 : index
    %c0_41 = arith.constant 0 : index
    %c0_42 = arith.constant 0 : index
    %55 = vector.load %arg3[%c4_40, %c0_41, %c0_42] : memref<7x256x256xbf16, #tpu.memory_space<vmem>>, vector<1x256x256xbf16>
    %56 = vector.shape_cast %55 : vector<1x256x256xbf16> to vector<256x256xbf16>
    %cst_43 = arith.constant dense<0.000000e+00> : vector<16x256xf32>
    %57 = tpu.matmul %54, %56, %cst_43 {dimension_numbers = #tpu.dot_dimension_numbers<[1], [0], [0], [1], [0, 0, 1, 1], [], []>} : vector<16x256xbf16>, vector<256x256xbf16>, vector<16x256xf32> -> vector<16x256xf32>
    %c5 = arith.constant 5 : index
    %c0_44 = arith.constant 0 : index
    %c0_45 = arith.constant 0 : index
    %58 = vector.load %arg4[%c5, %c0_44, %c0_45] : memref<8x1x256xf32, #tpu.memory_space<vmem>>, vector<1x1x256xf32>
    %59 = vector.shape_cast %58 : vector<1x1x256xf32> to vector<1x256xf32>
    %60 = vector.broadcast %59 : vector<1x256xf32> to vector<16x256xf32>
    %61 = arith.addf %57, %60 : vector<16x256xf32>
    %cst_46 = arith.constant 0.000000e+00 : f32
    %62 = vector.broadcast %cst_46 : f32 to vector<16x256xf32>
    %63 = arith.maximumf %61, %62 : vector<16x256xf32>
    %64 = arith.truncf %63 : vector<16x256xf32> to vector<16x256xbf16>
    %c5_47 = arith.constant 5 : index
    %c0_48 = arith.constant 0 : index
    %c0_49 = arith.constant 0 : index
    %65 = vector.load %arg3[%c5_47, %c0_48, %c0_49] : memref<7x256x256xbf16, #tpu.memory_space<vmem>>, vector<1x256x256xbf16>
    %66 = vector.shape_cast %65 : vector<1x256x256xbf16> to vector<256x256xbf16>
    %cst_50 = arith.constant dense<0.000000e+00> : vector<16x256xf32>
    %67 = tpu.matmul %64, %66, %cst_50 {dimension_numbers = #tpu.dot_dimension_numbers<[1], [0], [0], [1], [0, 0, 1, 1], [], []>} : vector<16x256xbf16>, vector<256x256xbf16>, vector<16x256xf32> -> vector<16x256xf32>
    %c6 = arith.constant 6 : index
    %c0_51 = arith.constant 0 : index
    %c0_52 = arith.constant 0 : index
    %68 = vector.load %arg4[%c6, %c0_51, %c0_52] : memref<8x1x256xf32, #tpu.memory_space<vmem>>, vector<1x1x256xf32>
    %69 = vector.shape_cast %68 : vector<1x1x256xf32> to vector<1x256xf32>
    %70 = vector.broadcast %69 : vector<1x256xf32> to vector<16x256xf32>
    %71 = arith.addf %67, %70 : vector<16x256xf32>
    %cst_53 = arith.constant 0.000000e+00 : f32
    %72 = vector.broadcast %cst_53 : f32 to vector<16x256xf32>
    %73 = arith.maximumf %71, %72 : vector<16x256xf32>
    %74 = arith.truncf %73 : vector<16x256xf32> to vector<16x256xbf16>
    %c6_54 = arith.constant 6 : index
    %c0_55 = arith.constant 0 : index
    %c0_56 = arith.constant 0 : index
    %75 = vector.load %arg3[%c6_54, %c0_55, %c0_56] : memref<7x256x256xbf16, #tpu.memory_space<vmem>>, vector<1x256x256xbf16>
    %76 = vector.shape_cast %75 : vector<1x256x256xbf16> to vector<256x256xbf16>
    %cst_57 = arith.constant dense<0.000000e+00> : vector<16x256xf32>
    %77 = tpu.matmul %74, %76, %cst_57 {dimension_numbers = #tpu.dot_dimension_numbers<[1], [0], [0], [1], [0, 0, 1, 1], [], []>} : vector<16x256xbf16>, vector<256x256xbf16>, vector<16x256xf32> -> vector<16x256xf32>
    %c7 = arith.constant 7 : index
    %c0_58 = arith.constant 0 : index
    %c0_59 = arith.constant 0 : index
    %78 = vector.load %arg4[%c7, %c0_58, %c0_59] : memref<8x1x256xf32, #tpu.memory_space<vmem>>, vector<1x1x256xf32>
    %79 = vector.shape_cast %78 : vector<1x1x256xf32> to vector<1x256xf32>
    %80 = vector.broadcast %79 : vector<1x256xf32> to vector<16x256xf32>
    %81 = arith.addf %77, %80 : vector<16x256xf32>
    %cst_60 = arith.constant 0.000000e+00 : f32
    %82 = vector.broadcast %cst_60 : f32 to vector<16x256xf32>
    %83 = arith.maximumf %81, %82 : vector<16x256xf32>
    %84 = arith.truncf %83 : vector<16x256xf32> to vector<16x256xbf16>
    %c0_61 = arith.constant 0 : index
    %c0_62 = arith.constant 0 : index
    %85 = vector.load %arg5[%c0_61, %c0_62] : memref<256x128xbf16, #tpu.memory_space<vmem>>, vector<256x128xbf16>
    %cst_63 = arith.constant dense<0.000000e+00> : vector<16x128xf32>
    %86 = tpu.matmul %84, %85, %cst_63 {dimension_numbers = #tpu.dot_dimension_numbers<[1], [0], [0], [1], [0, 0, 1, 1], [], []>} : vector<16x256xbf16>, vector<256x128xbf16>, vector<16x128xf32> -> vector<16x128xf32>
    %c0_64 = arith.constant 0 : index
    %c0_65 = arith.constant 0 : index
    %87 = vector.load %arg6[%c0_64, %c0_65] : memref<1x128xf32, #tpu.memory_space<vmem>>, vector<1x128xf32>
    %88 = vector.broadcast %87 : vector<1x128xf32> to vector<16x128xf32>
    %89 = arith.addf %86, %88 : vector<16x128xf32>
    %c0_66 = arith.constant 0 : index
    %c0_67 = arith.constant 0 : index
    %90 = vector.load %arg7[%c0_66, %c0_67] : memref<16x128xf32, #tpu.memory_space<vmem>>, vector<16x128xf32>
    tpu.vector_store %arg7[%c0_66, %c0_67], %89 {strides = array<i32>} : memref<16x128xf32, #tpu.memory_space<vmem>>, vector<16x128xf32>,
    return
  }
  func.func @transform_0(%arg0: i32) -> (i32, i32) {
    %c0_i32 = arith.constant 0 : i32
    %c0_i32_0 = arith.constant 0 : i32
    return %arg0, %c0_i32 : i32, i32
  }
  func.func @transform_1(%arg0: i32) -> (i32, i32, i32) {
    %c0_i32 = arith.constant 0 : i32
    %c0_i32_0 = arith.constant 0 : i32
    %c0_i32_1 = arith.constant 0 : i32
    %c0_i32_2 = arith.constant 0 : i32
    return %c0_i32, %c0_i32_0, %c0_i32_1 : i32, i32, i32
  }
  func.func @transform_2(%arg0: i32) -> (i32, i32, i32) {
    %c0_i32 = arith.constant 0 : i32
    %c0_i32_0 = arith.constant 0 : i32
    %c0_i32_1 = arith.constant 0 : i32
    %c0_i32_2 = arith.constant 0 : i32
    return %c0_i32, %c0_i32_0, %c0_i32_1 : i32, i32, i32
  }
  func.func @transform_3(%arg0: i32) -> (i32, i32, i32) {
    %c0_i32 = arith.constant 0 : i32
    %c0_i32_0 = arith.constant 0 : i32
    %c0_i32_1 = arith.constant 0 : i32
    %c0_i32_2 = arith.constant 0 : i32
    return %c0_i32, %c0_i32_0, %c0_i32_1 : i32, i32, i32
  }
  func.func @transform_4(%arg0: i32) -> (i32, i32) {
    %c0_i32 = arith.constant 0 : i32
    %c0_i32_0 = arith.constant 0 : i32
    %c0_i32_1 = arith.constant 0 : i32
    return %c0_i32, %c0_i32_0 : i32, i32
  }
  func.func @transform_5(%arg0: i32) -> (i32, i32) {
    %c0_i32 = arith.constant 0 : i32
    %c0_i32_0 = arith.constant 0 : i32
    %c0_i32_1 = arith.constant 0 : i32
    return %c0_i32, %c0_i32_0 : i32, i32
  }
  func.func @transform_6(%arg0: i32) -> (i32, i32) {
    %c0_i32 = arith.constant 0 : i32
    %c0_i32_0 = arith.constant 0 : i32
    return %arg0, %c0_i32 : i32, i32
  }
}

</mosaic_0001>

<bundles_post_ra>
// kernel: tpu_custom_call.1
= control target key start
LH: loop header
LB: loop body
LE: loop exit
PB: predicated region body
PF: predicated region fallthrough
CT: control target
= control target key end

     0   :  { %11 = vsyncpa [#allocation3], 0  ;;  %s4003_s0 = inlined_call_operand.hbm [shape: bf16[16,128], index: 0, kind: input, shape index: {}]   ;;  %s4004_s1 = inlined_call_operand.hbm [shape: bf16[2,128,256], index: 1, kind: input, shape index: {}]   ;;  %s4005_s2 = inlined_call_operand.hbm [shape: bf16[7,256,256], index: 2, kind: input, shape index: {}]   ;;  %s4006_s3 = inlined_call_operand.hbm [shape: f32[8,1,256], index: 3, kind: input, shape index: {}]   ;;  %s4007_s4 = inlined_call_operand.hbm [shape: bf16[256,128], index: 4, kind: input, shape index: {}]   ;;  %s4008_s5 = inlined_call_operand.vmem [shape: f32[1,128], index: 5, kind: input, shape index: {}]   ;;  %s4009_s6 = inlined_call_operand.hbm [shape: f32[16,128], index: 6, kind: output, shape index: {}]  }
   0x1   :  { %12 = vsyncpa [#allocation6], 0 }
   0x2   :  { %13 = vsyncpa [#allocation9], 0  ;;  %s32_s23 = sshll.u32 %s4004_s1, 4  ;;  %s33_s23 = int_to_ptr.hbm [resolvable:$true] %s32_s23 }
   0x3   :  { %14 = vsyncpa [#allocation4], 0  ;;  %s3922_s24 = smov [#allocation5]   ;;  %s58_s28 = sshll.u32 %s4006_s3, 4  ;;  %s59_s28 = int_to_ptr.hbm [resolvable:$true] %s58_s28 }
   0x4   :  { %s34_s25 = sshll.u32 %s3922_s24, 4  ;;  %s3923_s29 = smov 128   ;;  %s35_s25 = int_to_ptr.vmem [resolvable:$true] %s34_s25 }
   0x5   :  { %s3924_s30 = smov 8   ;;  %s3925_s7 = smov [#allocation8]  }
   0x6   :  { %40 = dma.hbm_to_vmem [thread:$0]  %s33_s23, 4096, %s35_s25, [#allocation6], %s3923_s29, %s3923_s29, %s3924_s30  }
   0x7   :  { %s60_s8 = sshll.u32 %s3925_s7, 4  ;;  %s3926_s1 = smov 32   ;;  %s61_s8 = int_to_ptr.vmem [resolvable:$true] %s60_s8 }
   0x8   :  { %s3927_s9 = smov 2   ;;  %s19_s12 = sshll.u32 %s4003_s0, 4  ;;  %s20_s12 = int_to_ptr.hbm [resolvable:$true] %s19_s12 }
   0x9   :  { %66 = dma.hbm_to_vmem [thread:$0]  %s59_s28, 256, %s61_s8, [#allocation9], %s3926_s1, %s3926_s1, %s3927_s9  }
   0xa   :  { %s3928_s13 = smov [#allocation2]   ;;  %s45_s16 = sshll.u32 %s4005_s2, 4  ;;  %s46_s16 = int_to_ptr.hbm [resolvable:$true] %s45_s16 }
   0xb   :  { %s21_s3 = sshll.u32 %s3928_s13, 4  ;;  %s3929_s17 = smov 64   ;;  %s22_s3 = int_to_ptr.vmem [resolvable:$true] %s21_s3 }
   0xc   :  { %s3930_s18 = smov 4   ;;  %s3931_s19 = smov [#allocation7]  }
   0xd   :  { %27 = dma.hbm_to_vmem [thread:$0]  %s20_s12, 128, %s22_s3, [#allocation3], %s3929_s17, %s3929_s17, %s3930_s18  }
   0xe   :  { %s47_s20 = sshll.u32 %s3931_s19, 4  ;;  %s71_s23 = sshll.u32 %s4007_s4, 4  ;;  %s48_s20 = int_to_ptr.vmem [resolvable:$true] %s47_s20  ;;  %s72_s23 = int_to_ptr.hbm [resolvable:$true] %s71_s23 }
   0xf   :  { %53 = dma.hbm_to_vmem [thread:$0]  %s46_s16, 28672, %s48_s20, [#allocation6], %s3923_s29, %s3923_s29, %s3924_s30  }
  0x10   :  { %s3932_s0 = smov [#allocation10]  }
  0x11   :  { %s73_s24 = sshll.u32 %s3932_s0, 4  ;;  %s74_s24 = int_to_ptr.vmem [resolvable:$true] %s73_s24 }
  0x12   :  { %79 = dma.hbm_to_vmem [thread:$0]  %s72_s23, 2048, %s74_s24, [#allocation9], %s3929_s17, %s3929_s17, %s3930_s18  }
  0x13   :  { %3914 = dma.done.wait [#allocation3], 128  }
  0x14   :  { %3915 = vsyncadd [#allocation3], 4294967168 }
  0x15   :  { %3916 = dma.done.wait [#allocation6], 32768  }
  0x16   :  { %3917 = vsyncadd [#allocation6], 4294934528 }
  0x17   :  { %3918 = dma.done.wait [#allocation9], 2304  }
  0x18   :  { %3919 = vsyncadd [#allocation9], 4294964992  ;;  %v2453_v0 = vld [vmem:[#allocation5 + $0x70] sm:$0xf]  ;;  %v3499_v1 = vld [vmem:[#allocation5 + $0x74] sm:$0xf0] }
  0x19   :  { %v3498_v2 = vld [vmem:[#allocation5 + $0x74] sm:$0xf]  ;;  %v2454_v3 = vor.u32 %v3499_v1, %v2453_v0  ;;  %v2455_v4 = vld [vmem:[#allocation5 + $0x78] sm:$0xf0]  ;;  %v2445_v5 = vld [vmem:[#allocation5 + $0x60] sm:$0xf] }
  0x1a   :  { %v3497_v6 = vld [vmem:[#allocation5 + $0x64] sm:$0xf0]  ;;  %v2458_v7 = vor.u32 %v3498_v2, %v2455_v4  ;;  %v3496_v8 = vld [vmem:[#allocation5 + $0x64] sm:$0xf]  ;;  %v2447_v9 = vld [vmem:[#allocation5 + $0x68] sm:$0xf0] }
  0x1b   :  { %212 = vmatpush.bf16.msra.mxu0 %v2454_v3  ;;  %v2446_v10 = vor.u32 %v3497_v6, %v2445_v5  ;;  %v2450_v11 = vor.u32 %v3496_v8, %v2447_v9  ;;  %v2437_v12 = vld [vmem:[#allocation5 + $0x50] sm:$0xf]  ;;  %v3495_v13 = vld [vmem:[#allocation5 + $0x54] sm:$0xf0]  ;;  %v3494_v14 = vld [vmem:[#allocation5 + $0x54] sm:$0xf] }
  0x1c   :  { %226 = vmatpush.bf16.msra.mxu1 %v2458_v7  ;;  %v2439_v15 = vld [vmem:[#allocation5 + $0x58] sm:$0xf0]  ;;  %v2438_v16 = vor.u32 %v3495_v13, %v2437_v12  ;;  %v2429_v18 = vld [vmem:[#allocation5 + $0x40] sm:$0xf]  ;;  %v3493_v19 = vld [vmem:[#allocation5 + $0x44] sm:$0xf0] }
  0x1d   :  { %v2442_v17 = vor.u32 %v3494_v14, %v2439_v15  ;;  %v3492_v20 = vld [vmem:[#allocation5 + $0x44] sm:$0xf]  ;;  %v2431_v21 = vld [vmem:[#allocation5 + $0x48] sm:$0xf0]  ;;  %v2430_v22 = vor.u32 %v3493_v19, %v2429_v18  ;;  %v2517_v23 = vld [vmem:[#allocation7 + $0x70] sm:$0xf] }
  0x1e   :  { %v3515_v24 = vld [vmem:[#allocation7 + $0x74] sm:$0xf0]  ;;  %v2581_v25 = vld [vmem:[#allocation7 + $0xf0] sm:$0xf]  ;;  %v2434_v26 = vor.u32 %v3492_v20, %v2431_v21  ;;  %v3490_v31 = vld [vmem:[#allocation5 + $0x34] sm:$0xf] }
  0x1f   :  { %213 = vmatpush.bf16.msra.mxu0 %v2446_v10  ;;  %v2421_v27 = vld [vmem:[#allocation5 + $0x30] sm:$0xf]  ;;  %v3491_v28 = vld [vmem:[#allocation5 + $0x34] sm:$0xf0]  ;;  %v2518_v29 = vor.u32 %v3515_v24, %v2517_v23  ;;  %v2423_v32 = vld [vmem:[#allocation5 + $0x38] sm:$0xf0] }
  0x20   :  { %227 = vmatpush.bf16.msra.mxu1 %v2450_v11  ;;  %v3531_v30 = vld [vmem:[#allocation7 + $0xf4] sm:$0xf0]  ;;  %v2509_v34 = vld [vmem:[#allocation7 + $0x60] sm:$0xf]  ;;  %v3513_v35 = vld [vmem:[#allocation7 + $0x64] sm:$0xf0]  ;;  %v2422_v38 = vor.u32 %v3491_v28, %v2421_v27  ;;  %v2426_v43 = vor.u32 %v3490_v31, %v2423_v32 }
  0x21   :  { %v2582_v33 = vor.u32 %v3531_v30, %v2581_v25  ;;  %445 = vmatpush.bf16.msra.mxu2 %v2518_v29  ;;  %v2573_v36 = vld [vmem:[#allocation7 + $0xe0] sm:$0xf]  ;;  %v3529_v37 = vld [vmem:[#allocation7 + $0xe4] sm:$0xf0]  ;;  %v2510_v41 = vor.u32 %v3513_v35, %v2509_v34  ;;  %v3488_v44 = vld [vmem:[#allocation5 + $0x24] sm:$0xf] }
  0x22   :  { %v2413_v39 = vld [vmem:[#allocation5 + $0x20] sm:$0xf]  ;;  %v3489_v40 = vld [vmem:[#allocation5 + $0x24] sm:$0xf0]  ;;  %v2574_v42 = vor.u32 %v3529_v37, %v2573_v36  ;;  %v2501_v45 = vld [vmem:[#allocation7 + $0x50] sm:$0xf] }
  0x23   :  { %214 = vmatpush.bf16.msra.mxu0 %v2438_v16  ;;  %459 = vmatpush.bf16.msra.mxu3 %v2582_v33  ;;  %v3511_v46 = vld [vmem:[#allocation7 + $0x54] sm:$0xf0]  ;;  %v2415_v47 = vld [vmem:[#allocation5 + $0x28] sm:$0xf0]  ;;  %v2565_v48 = vld [vmem:[#allocation7 + $0xd0] sm:$0xf]  ;;  %v2414_v51 = vor.u32 %v3489_v40, %v2413_v39 }
  0x24   :  { %228 = vmatpush.bf16.msra.mxu1 %v2442_v17  ;;  %v3527_v49 = vld [vmem:[#allocation7 + $0xd4] sm:$0xf0]  ;;  %v2502_v50 = vor.u32 %v3511_v46, %v2501_v45  ;;  %v2405_v52 = vld [vmem:[#allocation5 + $0x10] sm:$0xf]  ;;  %v2493_v54 = vld [vmem:[#allocation7 + $0x40] sm:$0xf]  ;;  %v2418_v56 = vor.u32 %v3488_v44, %v2415_v47 }
  0x25   :  { %446 = vmatpush.bf16.msra.mxu2 %v2510_v41  ;;  %v2566_v53 = vor.u32 %v3527_v49, %v2565_v48  ;;  %v3509_v55 = vld [vmem:[#allocation7 + $0x44] sm:$0xf0]  ;;  %v3487_v57 = vld [vmem:[#allocation5 + $0x14] sm:$0xf0]  ;;  %v2557_v58 = vld [vmem:[#allocation7 + $0xc0] sm:$0xf] }
  0x26   :  { %v3525_v59 = vld [vmem:[#allocation7 + $0xc4] sm:$0xf0]  ;;  %v3486_v60 = vld [vmem:[#allocation5 + $0x14] sm:$0xf]  ;;  %v2407_v61 = vld [vmem:[#allocation5 + $0x18] sm:$0xf0]  ;;  %v2494_v62 = vor.u32 %v3509_v55, %v2493_v54  ;;  %v2406_v63 = vor.u32 %v3487_v57, %v2405_v52 }
  0x27   :  { %215 = vmatpush.bf16.msra.mxu0 %v2430_v22  ;;  %460 = vmatpush.bf16.msra.mxu3 %v2574_v42  ;;  %v2558_v0 = vor.u32 %v3525_v59, %v2557_v58  ;;  %v2410_v1 = vor.u32 %v3486_v60, %v2407_v61  ;;  %v2397_v2 = vld [vmem:[#allocation5] sm:$0xf]  ;;  %v3485_v3 = vld [vmem:[#allocation5 + $0x4] sm:$0xf0]  ;;  %v3484_v4 = vld [vmem:[#allocation5 + $0x4] sm:$0xf] }
  0x28   :  { %229 = vmatpush.bf16.msra.mxu1 %v2434_v26  ;;  %v2399_v5 = vld [vmem:[#allocation5 + $0x8] sm:$0xf0]  ;;  %v3514_v6 = vld [vmem:[#allocation7 + $0x74] sm:$0xf]  ;;  %v2519_v7 = vld [vmem:[#allocation7 + $0x78] sm:$0xf0]  ;;  %v2398_v10 = vor.u32 %v3485_v3, %v2397_v2 }
  0x29   :  { %447 = vmatpush.bf16.msra.mxu2 %v2502_v50  ;;  %v3530_v8 = vld [vmem:[#allocation7 + $0xf4] sm:$0xf]  ;;  %v2583_v9 = vld [vmem:[#allocation7 + $0xf8] sm:$0xf0]  ;;  %v2402_v11 = vor.u32 %v3484_v4, %v2399_v5  ;;  %v2522_v12 = vor.u32 %v3514_v6, %v2519_v7  ;;  %v3512_v14 = vld [vmem:[#allocation7 + $0x64] sm:$0xf] }
  0x2a   :  { %v2586_v13 = vor.u32 %v3530_v8, %v2583_v9  ;;  %v2511_v15 = vld [vmem:[#allocation7 + $0x68] sm:$0xf0]  ;;  %v3483_v16 = vld [vmem:[#allocation2] sm:$0xff]  ;;  %v3528_v17 = vld [vmem:[#allocation7 + $0xe4] sm:$0xf]  ;;  %s3933_s25 = smov [#allocation11]  }
  0x2b   :  { %216 = vmatpush.bf16.msra.mxu0 %v2422_v38  ;;  %461 = vmatpush.bf16.msra.mxu3 %v2566_v53  ;;  %v2575_v18 = vld [vmem:[#allocation7 + $0xe8] sm:$0xf0]  ;;  %v2514_v19 = vor.u32 %v3512_v14, %v2511_v15  ;;  %v3510_v21 = vld [vmem:[#allocation7 + $0x54] sm:$0xf]  ;;  %v2503_v22 = vld [vmem:[#allocation7 + $0x58] sm:$0xf0] }
  0x2c   :  { %230 = vmatpush.bf16.msra.mxu1 %v2426_v43  ;;  %v2578_v20 = vor.u32 %v3528_v17, %v2575_v18  ;;  %v3526_v23 = vld [vmem:[#allocation7 + $0xd4] sm:$0xf]  ;;  %v2567_v24 = vld [vmem:[#allocation7 + $0xd8] sm:$0xf0]  ;;  %v2506_v25 = vor.u32 %v3510_v21, %v2503_v22  ;;  %v3508_v27 = vld [vmem:[#allocation7 + $0x44] sm:$0xf] }
  0x2d   :  { %448 = vmatpush.bf16.msra.mxu2 %v2494_v62  ;;  %v2570_v26 = vor.u32 %v3526_v23, %v2567_v24  ;;  %v2495_v28 = vld [vmem:[#allocation7 + $0x48] sm:$0xf0]  ;;  %v3524_v29 = vld [vmem:[#allocation7 + $0xc4] sm:$0xf]  ;;  %v2485_v33 = vld [vmem:[#allocation7 + $0x30] sm:$0xf] }
  0x2e   :  { %v2559_v30 = vld [vmem:[#allocation7 + $0xc8] sm:$0xf0]  ;;  %v2498_v31 = vor.u32 %v3508_v27, %v2495_v28  ;;  %v3507_v34 = vld [vmem:[#allocation7 + $0x34] sm:$0xf0]  ;;  %v2549_v35 = vld [vmem:[#allocation7 + $0xb0] sm:$0xf] }
  0x2f   :  { %217 = vmatpush.bf16.msra.mxu0 %v2414_v51  ;;  %462 = vmatpush.bf16.msra.mxu3 %v2558_v0  ;;  %v2562_v32 = vor.u32 %v3524_v29, %v2559_v30  ;;  %v2486_v36 = vor.u32 %v3507_v34, %v2485_v33  ;;  %v3523_v37 = vld [vmem:[#allocation7 + $0xb4] sm:$0xf0]  ;;  %v3506_v38 = vld [vmem:[#allocation7 + $0x34] sm:$0xf]  ;;  %v2487_v39 = vld [vmem:[#allocation7 + $0x38] sm:$0xf0] }
  0x30   :  { %231 = vmatpush.bf16.msra.mxu1 %v2418_v56  ;;  %v2550_v40 = vor.u32 %v3523_v37, %v2549_v35  ;;  %v2490_v41 = vor.u32 %v3506_v38, %v2487_v39  ;;  %v3522_v42 = vld [vmem:[#allocation7 + $0xb4] sm:$0xf]  ;;  %v2551_v43 = vld [vmem:[#allocation7 + $0xb8] sm:$0xf0]  ;;  %v2477_v45 = vld [vmem:[#allocation7 + $0x20] sm:$0xf] }
  0x31   :  { %449 = vmatpush.bf16.msra.mxu2 %v2486_v36  ;;  %v2554_v44 = vor.u32 %v3522_v42, %v2551_v43  ;;  %v3505_v46 = vld [vmem:[#allocation7 + $0x24] sm:$0xf0]  ;;  %v2541_v48 = vld [vmem:[#allocation7 + $0xa0] sm:$0xf]  ;;  %v3504_v50 = vld [vmem:[#allocation7 + $0x24] sm:$0xf] }
  0x32   :  { %v2478_v47 = vor.u32 %v3505_v46, %v2477_v45  ;;  %v3521_v49 = vld [vmem:[#allocation7 + $0xa4] sm:$0xf0]  ;;  %v2479_v52 = vld [vmem:[#allocation7 + $0x28] sm:$0xf0]  ;;  %v3520_v53 = vld [vmem:[#allocation7 + $0xa4] sm:$0xf] }
  0x33   :  { %218 = vmatpush.bf16.msra.mxu0 %v2406_v63  ;;  %463 = vmatpush.bf16.msra.mxu3 %v2550_v40  ;;  %v2542_v51 = vor.u32 %v3521_v49, %v2541_v48  ;;  %v2543_v54 = vld [vmem:[#allocation7 + $0xa8] sm:$0xf0]  ;;  %v2482_v55 = vor.u32 %v3504_v50, %v2479_v52  ;;  %v2469_v57 = vld [vmem:[#allocation7 + $0x10] sm:$0xf]  ;;  %v3503_v58 = vld [vmem:[#allocation7 + $0x14] sm:$0xf0] }
  0x34   :  { %232 = vmatpush.bf16.msra.mxu1 %v2410_v1  ;;  %v2546_v56 = vor.u32 %v3520_v53, %v2543_v54  ;;  %v2533_v59 = vld [vmem:[#allocation7 + $0x90] sm:$0xf]  ;;  %v2470_v60 = vor.u32 %v3503_v58, %v2469_v57  ;;  %v3519_v61 = vld [vmem:[#allocation7 + $0x94] sm:$0xf0]  ;;  %v3502_v62 = vld [vmem:[#allocation7 + $0x14] sm:$0xf] }
  0x35   :  { %450 = vmatpush.bf16.msra.mxu2 %v2478_v47  ;;  %v2471_v63 = vld [vmem:[#allocation7 + $0x18] sm:$0xf0]  ;;  %v2534_v0 = vor.u32 %v3519_v61, %v2533_v59  ;;  %v3518_v2 = vld [vmem:[#allocation7 + $0x94] sm:$0xf]  ;;  %v2461_v5 = vld [vmem:[#allocation7] sm:$0xf] }
  0x36   :  { %v2474_v1 = vor.u32 %v3502_v62, %v2471_v63  ;;  %v2535_v3 = vld [vmem:[#allocation7 + $0x98] sm:$0xf0]  ;;  %v3501_v6 = vld [vmem:[#allocation7 + $0x4] sm:$0xf0]  ;;  %v2525_v7 = vld [vmem:[#allocation7 + $0x80] sm:$0xf] }
  0x37   :  { %219 = vmatpush.bf16.msra.mxu0 %v2398_v10  ;;  %464 = vmatpush.bf16.msra.mxu3 %v2542_v51  ;;  %v2538_v4 = vor.u32 %v3518_v2, %v2535_v3  ;;  %v2462_v8 = vor.u32 %v3501_v6, %v2461_v5  ;;  %v3517_v9 = vld [vmem:[#allocation7 + $0x84] sm:$0xf0]  ;;  %v3500_v10 = vld [vmem:[#allocation7 + $0x4] sm:$0xf]  ;;  %v2527_v15 = vld [vmem:[#allocation7 + $0x88] sm:$0xf0] }
  0x38   :  { %233 = vmatpush.bf16.msra.mxu1 %v2402_v11  ;;  %v2463_v11 = vld [vmem:[#allocation7 + $0x8] sm:$0xf0]  ;;  %v3516_v14 = vld [vmem:[#allocation7 + $0x84] sm:$0xf]  ;;  %v2709_v17 = vld [vmem:[#allocation7 + $0x1f0] sm:$0xf] }
  0x39   :  { %451 = vmatpush.bf16.msra.mxu2 %v2470_v60  ;;  %v3563_v18 = vld [vmem:[#allocation7 + $0x1f4] sm:$0xf0]  ;;  %v2711_v21 = vld [vmem:[#allocation7 + $0x1f8] sm:$0xf0]  ;;  %v2701_v22 = vld [vmem:[#allocation7 + $0x1e0] sm:$0xf] }
  0x3a   :  { %220 = vmatmul.bf16.vlgmr.msra.gmra.mxu0 %v3483_v16  ;;  %v3561_v23 = vld [vmem:[#allocation7 + $0x1e4] sm:$0xf0]  ;;  %v2645_v27 = vld [vmem:[#allocation7 + $0x170] sm:$0xf]  ;;  %v3547_v29 = vld [vmem:[#allocation7 + $0x174] sm:$0xf0] }
  0x3b   :  { %473 = vmatpush.bf16.msrb.mxu0 %v2522_v12  ;;  %234 = vmatmul.bf16.vlgmr.msra.gmra.mxu1 %v3483_v16  ;;  %v2526_v12 = vor.u32 %v3517_v9, %v2525_v7  ;;  %v2530_v16 = vor.u32 %v3516_v14, %v2527_v15  ;;  %v2702_v28 = vor.u32 %v3561_v23, %v2701_v22  ;;  %v3546_v30 = vld [vmem:[#allocation7 + $0x174] sm:$0xf]  ;;  %v2693_v35 = vld [vmem:[#allocation7 + $0x1d0] sm:$0xf]  ;;  %v3559_v36 = vld [vmem:[#allocation7 + $0x1d4] sm:$0xf0] }
  0x3c   :  { %487 = vmatpush.bf16.msrb.mxu1 %v2586_v13  ;;  %465 = vmatpush.bf16.msra.mxu3 %v2534_v0  ;;  %v2466_v13 = vor.u32 %v3500_v10, %v2463_v11  ;;  %v2646_v33 = vor.u32 %v3547_v29, %v2645_v27  ;;  %v3558_v37 = vld [vmem:[#allocation7 + $0x1d4] sm:$0xf]  ;;  %v2695_v38 = vld [vmem:[#allocation7 + $0x1d8] sm:$0xf0]  ;;  %v2637_v39 = vld [vmem:[#allocation7 + $0x160] sm:$0xf] }
  0x3d   :  { %452 = vmatpush.bf16.msra.mxu2 %v2462_v8  ;;  %v3545_v40 = vld [vmem:[#allocation7 + $0x164] sm:$0xf0]  ;;  %v3544_v42 = vld [vmem:[#allocation7 + $0x164] sm:$0xf]  ;;  %v2639_v43 = vld [vmem:[#allocation7 + $0x168] sm:$0xf0]  ;;  %v2698_v46 = vor.u32 %v3558_v37, %v2695_v38 }
  0x3e   :  { %v2642_v45 = vor.u32 %v3544_v42, %v2639_v43  ;;  %v2685_v47 = vld [vmem:[#allocation7 + $0x1c0] sm:$0xf]  ;;  %v3557_v48 = vld [vmem:[#allocation7 + $0x1c4] sm:$0xf0]  ;;  %v3556_v49 = vld [vmem:[#allocation7 + $0x1c4] sm:$0xf] }
  0x3f   :  { %474 = vmatpush.bf16.msrb.mxu0 %v2514_v19  ;;  %v3562_v19 = vld [vmem:[#allocation7 + $0x1f4] sm:$0xf]  ;;  %v2687_v50 = vld [vmem:[#allocation7 + $0x1c8] sm:$0xf0]  ;;  %v2686_v51 = vor.u32 %v3557_v48, %v2685_v47  ;;  %v120_v53 = vld [vmem:[#allocation8] sm:$0x3] }
  0x40   :  { %488 = vmatpush.bf16.msrb.mxu1 %v2578_v20  ;;  %466 = vmatpush.bf16.msra.mxu3 %v2526_v12  ;;  %v2710_v20 = vor.u32 %v3563_v18, %v2709_v17  ;;  %v2714_v24 = vor.u32 %v3562_v19, %v2711_v21  ;;  %v2690_v52 = vor.u32 %v3556_v49, %v2687_v50  ;;  %v123_v57 = vperm.slane %v120_v53, 1  ;;  %v2629_v6 = vld [vmem:[#allocation7 + $0x150] sm:$0xf]  ;;  %v3543_v7 = vld [vmem:[#allocation7 + $0x154] sm:$0xf0]  ;;  %s2374_s26 = sshll.u32 %s3933_s25, 4  ;;  %s2375_s26 = int_to_ptr.vmem [resolvable:$true] %s2374_s26 }
  0x41   :  { %707 = vmatpush.bf16.msrb.mxu2 %v2646_v33  ;;  %v3542_v8 = vld [vmem:[#allocation7 + $0x154] sm:$0xf]  ;;  %v2630_v9 = vor.u32 %v3543_v7, %v2629_v6  ;;  %v2631_v10 = vld [vmem:[#allocation7 + $0x158] sm:$0xf0]  ;;  %v2677_v12 = vld [vmem:[#allocation7 + $0x1b0] sm:$0xf] }
  0x42   :  { %v2634_v11 = vor.u32 %v3542_v8, %v2631_v10  ;;  %v3554_v14 = vld [vmem:[#allocation7 + $0x1b4] sm:$0xf]  ;;  %v2621_v18 = vld [vmem:[#allocation7 + $0x140] sm:$0xf]  ;;  %v3541_v19 = vld [vmem:[#allocation7 + $0x144] sm:$0xf0] }
  0x43   :  { %475 = vmatpush.bf16.msrb.mxu0 %v2506_v25  ;;  %v3560_v25 = vld [vmem:[#allocation7 + $0x1e4] sm:$0xf]  ;;  %v2622_v21 = vor.u32 %v3541_v19, %v2621_v18  ;;  %v2623_v22 = vld [vmem:[#allocation7 + $0x148] sm:$0xf0]  ;;  %v3551_v37 = vld [vmem:[#allocation7 + $0x194] sm:$0xf0] }
  0x44   :  { %489 = vmatpush.bf16.msrb.mxu1 %v2570_v26  ;;  %v2703_v26 = vld [vmem:[#allocation7 + $0x1e8] sm:$0xf0]  ;;  %721 = vmatpush.bf16.msrb.mxu3 %v2710_v20  ;;  %v3540_v20 = vld [vmem:[#allocation7 + $0x144] sm:$0xf]  ;;  %v3550_v38 = vld [vmem:[#allocation7 + $0x194] sm:$0xf] }
  0x45   :  { %v2626_v23 = vor.u32 %v3540_v20, %v2623_v22  ;;  %v2605_v42 = vld [vmem:[#allocation7 + $0x120] sm:$0xf]  ;;  %v3537_v43 = vld [vmem:[#allocation7 + $0x124] sm:$0xf0]  ;;  %v3548_v50 = vld [vmem:[#allocation7 + $0x184] sm:$0xf] }
  0x46   :  { %v2653_v48 = vld [vmem:[#allocation7 + $0x180] sm:$0xf]  ;;  %v3549_v49 = vld [vmem:[#allocation7 + $0x184] sm:$0xf0]  ;;  %v2839_v6 = vld [vmem:[#allocation7 + $0x2f8] sm:$0xf0] }
  0x47   :  { %476 = vmatpush.bf16.msrb.mxu0 %v2498_v31  ;;  %v2647_v31 = vld [vmem:[#allocation7 + $0x178] sm:$0xf0]  ;;  %v2829_v7 = vld [vmem:[#allocation7 + $0x2e0] sm:$0xf]  ;;  %v3593_v8 = vld [vmem:[#allocation7 + $0x2e4] sm:$0xf0] }
  0x48   :  { %490 = vmatpush.bf16.msrb.mxu1 %v2562_v32  ;;  %v2706_v32 = vor.u32 %v3560_v25, %v2703_v26  ;;  %v2650_v34 = vor.u32 %v3546_v30, %v2647_v31  ;;  %722 = vmatpush.bf16.msrb.mxu3 %v2702_v28  ;;  %v3553_v25 = vld [vmem:[#allocation7 + $0x1a4] sm:$0xf0]  ;;  %v3552_v26 = vld [vmem:[#allocation7 + $0x1a4] sm:$0xf]  ;;  %v2671_v28 = vld [vmem:[#allocation7 + $0x1a8] sm:$0xf0] }
  0x49   :  { %v2674_v29 = vor.u32 %v3552_v26, %v2671_v28  ;;  %v2613_v30 = vld [vmem:[#allocation7 + $0x130] sm:$0xf]  ;;  %v3539_v31 = vld [vmem:[#allocation7 + $0x134] sm:$0xf0]  ;;  %v3592_v10 = vld [vmem:[#allocation7 + $0x2e4] sm:$0xf] }
  0x4a   :  { %v2614_v33 = vor.u32 %v3539_v31, %v2613_v30  ;;  %v279_v20 = vld [vmem:[#allocation8 + $0x2] sm:$0x3]  ;;  %s2376_s7 = sshll.u32 %s4009_s6, 4  ;;  %s2377_s7 = int_to_ptr.hbm [resolvable:$true] %s2376_s7 }
  0x4b   :  { %477 = vmatpush.bf16.msrb.mxu0 %v2490_v41  ;;  %v2638_v41 = vor.u32 %v3545_v40, %v2637_v39  ;;  %v2663_v40 = vld [vmem:[#allocation7 + $0x198] sm:$0xf0]  ;;  %v282_v22 = vperm.slane %v279_v20, 1  ;;  %v281_v26 = vperm.slane %v279_v20, 0 }
  0x4c   :  { %491 = vmatpush.bf16.msrb.mxu1 %v2554_v44  ;;  %v2694_v44 = vor.u32 %v3559_v36, %v2693_v35  ;;  %v2661_v36 = vld [vmem:[#allocation7 + $0x190] sm:$0xf] }
  0x4d   :  { %708 = vmatpush.bf16.msrb.mxu2 %v2638_v41  ;;  %v2662_v39 = vor.u32 %v3551_v37, %v2661_v36  ;;  %v2666_v41 = vor.u32 %v3550_v38, %v2663_v40 }
  0x4e   :  { %723 = vmatpush.bf16.msrb.mxu3 %v2694_v44  ;;  %v3536_v44 = vld [vmem:[#allocation7 + $0x124] sm:$0xf] }
  0x4f   :  { %478 = vmatpush.bf16.msrb.mxu0 %v2482_v55 }
  0x50   :  { %492 = vmatpush.bf16.msrb.mxu1 %v2546_v56  ;;  %v122_v56 = vperm.slane %v120_v53, 0 }
  0x51   :  { %709 = vmatpush.bf16.msrb.mxu2 %v2630_v9 }
  0x52   :  { %724 = vmatpush.bf16.msrb.mxu3 %v2686_v51  ;;  %v2654_v51 = vor.u32 %v3549_v49, %v2653_v48  ;;  %v2823_v49 = vld [vmem:[#allocation7 + $0x2d8] sm:$0xf0] }
  0x53   :  { %479 = vmatpush.bf16.msrb.mxu0 %v2474_v1 }
  0x54   :  { %493 = vmatpush.bf16.msrb.mxu1 %v2538_v4 }
  0x55   :  { %710 = vmatpush.bf16.msrb.mxu2 %v2622_v21 }
  0x57   :  { %480 = vmatpush.bf16.msrb.mxu0 %v2466_v13  ;;  %v3555_v13 = vld [vmem:[#allocation7 + $0x1b4] sm:$0xf0] }
  0x58   :  { %494 = vmatpush.bf16.msrb.mxu1 %v2530_v16  ;;  %v2678_v15 = vor.u32 %v3555_v13, %v2677_v12  ;;  %v2679_v16 = vld [vmem:[#allocation7 + $0x1b8] sm:$0xf0]  ;;  %v2773_v12 = vld [vmem:[#allocation7 + $0x270] sm:$0xf]  ;;  %v2830_v13 = vor.u32 %v3593_v8, %v2829_v7  ;;  %v3586_v8 = vld [vmem:[#allocation7 + $0x2b4] sm:$0xf] }
  0x59   :  { %v2682_v17 = vor.u32 %v3554_v14, %v2679_v16  ;;  %711 = vmatpush.bf16.msrb.mxu2 %v2614_v33  ;;  %v3579_v14 = vld [vmem:[#allocation7 + $0x274] sm:$0xf0]  ;;  %v2775_v16 = vld [vmem:[#allocation7 + $0x278] sm:$0xf0] }
  0x5a   :  { %725 = vmatpush.bf16.msrb.mxu3 %v2678_v15  ;;  %v3578_v15 = vld [vmem:[#allocation7 + $0x274] sm:$0xf]  ;;  %v2774_v18 = vor.u32 %v3579_v14, %v2773_v12  ;;  %v3573_v12 = vld [vmem:[#allocation7 + $0x244] sm:$0xf0] }
  0x5b   :  { %735 = vmatpush.bf16.msra.mxu0 %v2650_v34  ;;  %v2615_v34 = vld [vmem:[#allocation7 + $0x138] sm:$0xf0]  ;;  %v2778_v19 = vor.u32 %v3578_v15, %v2775_v16  ;;  %v2751_v15 = vld [vmem:[#allocation7 + $0x248] sm:$0xf0] }
  0x5c   :  { %749 = vmatpush.bf16.msra.mxu1 %v2714_v24  ;;  %v2669_v24 = vld [vmem:[#allocation7 + $0x1a0] sm:$0xf] }
  0x5d   :  { %v2670_v27 = vor.u32 %v3553_v25, %v2669_v24 }
  0x5f   :  { %736 = vmatpush.bf16.msra.mxu0 %v2642_v45  ;;  %726 = vmatpush.bf16.msrb.mxu3 %v2670_v27  ;;  %v2606_v45 = vor.u32 %v3537_v43, %v2605_v42 }
  0x60   :  { %750 = vmatpush.bf16.msra.mxu1 %v2706_v32  ;;  %v3538_v32 = vld [vmem:[#allocation7 + $0x134] sm:$0xf] }
  0x61   :  { %v2618_v35 = vor.u32 %v3538_v32, %v2615_v34  ;;  %712 = vmatpush.bf16.msrb.mxu2 %v2606_v45  ;;  %v2821_v45 = vld [vmem:[#allocation7 + $0x2d0] sm:$0xf] }
  0x63   :  { %737 = vmatpush.bf16.msra.mxu0 %v2634_v11  ;;  %727 = vmatpush.bf16.msrb.mxu3 %v2662_v39  ;;  %v2831_v11 = vld [vmem:[#allocation7 + $0x2e8] sm:$0xf0] }
  0x64   :  { %751 = vmatpush.bf16.msra.mxu1 %v2698_v46  ;;  %v2607_v46 = vld [vmem:[#allocation7 + $0x128] sm:$0xf0] }
  0x65   :  { %v2610_v47 = vor.u32 %v3536_v44, %v2607_v46  ;;  %v3591_v46 = vld [vmem:[#allocation7 + $0x2d4] sm:$0xf0] }
  0x66   :  { %v2822_v48 = vor.u32 %v3591_v46, %v2821_v45  ;;  %v2783_v45 = vld [vmem:[#allocation7 + $0x288] sm:$0xf0] }
  0x67   :  { %738 = vmatpush.bf16.msra.mxu0 %v2626_v23  ;;  %728 = vmatpush.bf16.msrb.mxu3 %v2654_v51  ;;  %v2765_v51 = vld [vmem:[#allocation7 + $0x260] sm:$0xf] }
  0x68   :  { %752 = vmatpush.bf16.msra.mxu1 %v2690_v52  ;;  %v2655_v52 = vld [vmem:[#allocation7 + $0x188] sm:$0xf0] }
  0x69   :  { %v2658_v53 = vor.u32 %v3548_v50, %v2655_v52  ;;  %v3577_v52 = vld [vmem:[#allocation7 + $0x264] sm:$0xf0] }
  0x6b   :  { %739 = vmatpush.bf16.msra.mxu0 %v2618_v35 }
  0x6c   :  { %753 = vmatpush.bf16.msra.mxu1 %v2682_v17  ;;  %v2834_v17 = vor.u32 %v3592_v10, %v2831_v11  ;;  %v2749_v11 = vld [vmem:[#allocation7 + $0x240] sm:$0xf] }
  0x6d   :  { %v2750_v14 = vor.u32 %v3573_v12, %v2749_v11  ;;  %v3990_v11 = vld [vmem:[#allocation8 + $0x4] sm:$0x3] }
  0x6f   :  { %740 = vmatpush.bf16.msra.mxu0 %v2610_v47  ;;  %v3590_v47 = vld [vmem:[#allocation7 + $0x2d4] sm:$0xf] }
  0x70   :  { %754 = vmatpush.bf16.msra.mxu1 %v2674_v29  ;;  %v2826_v50 = vor.u32 %v3590_v47, %v2823_v49  ;;  %v2725_v47 = vld [vmem:[#allocation7 + $0x210] sm:$0xf]  ;;  %v3566_v49 = vld [vmem:[#allocation7 + $0x214] sm:$0xf] }
  0x74   :  { %755 = vmatpush.bf16.msra.mxu1 %v2666_v41 }
  0x78   :  { %756 = vmatpush.bf16.msra.mxu1 %v2658_v53  ;;  %v3576_v53 = vld [vmem:[#allocation7 + $0x264] sm:$0xf] }
  0xb7   :  { %v221_v54 = vpop.f32.mrf.mxu0 }
  0xb8   :  { %v235_v55 = vpop.f32.mrf.mxu1  ;;  %v222_v58 = vadd.f32 %v221_v54, %v122_v56  ;;  %v2597_v54 = vld [vmem:[#allocation7 + $0x110] sm:$0xf] }
  0xb9   :  { %v236_v59 = vadd.f32 %v235_v55, %v123_v57  ;;  %v3535_v55 = vld [vmem:[#allocation7 + $0x114] sm:$0xf0] }
  0xba   :  { %v240_v0 = vmax.f32 %v222_v58, 0.0  ;;  %v2599_v58 = vld [vmem:[#allocation7 + $0x118] sm:$0xf0] }
  0xbb   :  { %v241_v2 = vmax.f32 %v236_v59, 0.0 }
  0xbf   :  { %v223_v60 = vpop.f32.mrf.mxu0 }
  0xc0   :  { %v224_v61 = vadd.f32 %v223_v60, %v122_v56  ;;  %v237_v62 = vpop.f32.mrf.mxu1  ;;  %v3534_v56 = vld [vmem:[#allocation7 + $0x114] sm:$0xf]  ;;  %v2589_v60 = vld [vmem:[#allocation7 + $0x100] sm:$0xf] }
  0xc1   :  { %v238_v63 = vadd.f32 %v237_v62, %v123_v57  ;;  %v2598_v57 = vor.u32 %v3535_v55, %v2597_v54  ;;  %v2602_v59 = vor.u32 %v3534_v56, %v2599_v58  ;;  %v3532_v62 = vld [vmem:[#allocation7 + $0x104] sm:$0xf]  ;;  %v2766_v54 = vor.u32 %v3577_v52, %v2765_v51  ;;  %v2767_v55 = vld [vmem:[#allocation7 + $0x268] sm:$0xf0]  ;;  %v2813_v56 = vld [vmem:[#allocation7 + $0x2c0] sm:$0xf] }
  0xc2   :  { %v242_v1 = vmax.f32 %v224_v61, 0.0  ;;  %v3533_v61 = vld [vmem:[#allocation7 + $0x104] sm:$0xf0]  ;;  %v2770_v58 = vor.u32 %v3576_v53, %v2767_v55  ;;  %v2727_v51 = vld [vmem:[#allocation7 + $0x218] sm:$0xf0] }
  0xc3   :  { %v243_v3 = vmax.f32 %v238_v63, 0.0  ;;  %713 = vmatpush.bf16.msrb.mxu2 %v2598_v57  ;;  %741 = vmatpush.bf16.msra.mxu0 %v2602_v59  ;;  %v2590_v63 = vor.u32 %v3533_v61, %v2589_v60  ;;  %v3589_v57 = vld [vmem:[#allocation7 + $0x2c4] sm:$0xf0]  ;;  %v3588_v60 = vld [vmem:[#allocation7 + $0x2c4] sm:$0xf]  ;;  %v2730_v52 = vor.u32 %v3566_v49, %v2727_v51 }
  0xc4   :  { %v244_v4 = vpack.c.bf16 %v242_v1, %v240_v0  ;;  %v2591_v0 = vld [vmem:[#allocation7 + $0x108] sm:$0xf0]  ;;  %v2814_v59 = vor.u32 %v3589_v57, %v2813_v56  ;;  %v2717_v53 = vld [vmem:[#allocation7 + $0x200] sm:$0xf]  ;;  %v3564_v55 = vld [vmem:[#allocation7 + $0x204] sm:$0xf] }
  0xc5   :  { %v245_v5 = vpack.c.bf16 %v243_v3, %v241_v2  ;;  %v2594_v1 = vor.u32 %v3532_v62, %v2591_v0  ;;  %v2837_v2 = vld [vmem:[#allocation7 + $0x2f0] sm:$0xf]  ;;  %v3595_v3 = vld [vmem:[#allocation7 + $0x2f4] sm:$0xf0]  ;;  %v2815_v61 = vld [vmem:[#allocation7 + $0x2c8] sm:$0xf0] }
  0xc6   :  { %453 = vmatmul.bf16.vlgmr.msra.gmra.mxu2 %v244_v4  ;;  %481 = vmatmul.bf16.vlgmr.msrb.gmra.mxu0 %v244_v4  ;;  %v3594_v4 = vld [vmem:[#allocation7 + $0x2f4] sm:$0xf]  ;;  %v2818_v62 = vor.u32 %v3588_v60, %v2815_v61  ;;  %v3575_v0 = vld [vmem:[#allocation7 + $0x254] sm:$0xf0]  ;;  %v2719_v57 = vld [vmem:[#allocation7 + $0x208] sm:$0xf0] }
  0xc7   :  { %467 = vmatmul.bf16.vlgmr.msra.gmra.mxu3 %v245_v5  ;;  %495 = vmatmul.bf16.vlgmr.msrb.gmra.mxu1 %v245_v5  ;;  %v2838_v5 = vor.u32 %v3595_v3, %v2837_v2  ;;  %v2842_v9 = vor.u32 %v3594_v4, %v2839_v6  ;;  %v2759_v3 = vld [vmem:[#allocation7 + $0x258] sm:$0xf0]  ;;  %v3587_v6 = vld [vmem:[#allocation7 + $0x2b4] sm:$0xf0]  ;;  %v3640_v61 = vld [vmem:[#allocation5 + $0xe4] sm:$0xf] }
  0xc8   :  { %714 = vmatpush.bf16.msrb.mxu2 %v2590_v63  ;;  %742 = vmatpush.bf16.msra.mxu0 %v2594_v1  ;;  %v2757_v63 = vld [vmem:[#allocation7 + $0x250] sm:$0xf]  ;;  %v3574_v1 = vld [vmem:[#allocation7 + $0x254] sm:$0xf]  ;;  %v2903_v60 = vld [vmem:[#allocation5 + $0xf8] sm:$0xf0] }
  0xc9   :  { %983 = vmatpush.bf16.msra.mxu3 %v2838_v5  ;;  %1011 = vmatpush.bf16.msrb.mxu1 %v2842_v9  ;;  %v2758_v2 = vor.u32 %v3575_v0, %v2757_v63  ;;  %v2762_v4 = vor.u32 %v3574_v1, %v2759_v3  ;;  %v2805_v5 = vld [vmem:[#allocation7 + $0x2b0] sm:$0xf]  ;;  %v2807_v9 = vld [vmem:[#allocation7 + $0x2b8] sm:$0xf0]  ;;  %v2895_v63 = vld [vmem:[#allocation5 + $0xe8] sm:$0xf0] }
  0xca   :  { %v2806_v7 = vor.u32 %v3587_v6, %v2805_v5  ;;  %v2810_v10 = vor.u32 %v3586_v8, %v2807_v9  ;;  %v2901_v0 = vld [vmem:[#allocation5 + $0xf0] sm:$0xf]  ;;  %v3643_v1 = vld [vmem:[#allocation5 + $0xf4] sm:$0xf0]  ;;  %v2893_v3 = vld [vmem:[#allocation5 + $0xe0] sm:$0xf] }
  0xcb   :  { %v3641_v5 = vld [vmem:[#allocation5 + $0xe4] sm:$0xf0]  ;;  %v3638_v6 = vld [vmem:[#allocation5 + $0xd4] sm:$0xf]  ;;  %v2885_v9 = vld [vmem:[#allocation5 + $0xd0] sm:$0xf] }
  0xcc   :  { %969 = vmatpush.bf16.msra.mxu2 %v2774_v18  ;;  %997 = vmatpush.bf16.msrb.mxu0 %v2778_v19  ;;  %v3585_v18 = vld [vmem:[#allocation7 + $0x2a4] sm:$0xf0]  ;;  %v3584_v19 = vld [vmem:[#allocation7 + $0x2a4] sm:$0xf]  ;;  %v2894_v8 = vor.u32 %v3641_v5, %v2893_v3  ;;  %v3626_v5 = vld [vmem:[#allocation7 + $0x3f4] sm:$0xf] }
  0xcd   :  { %984 = vmatpush.bf16.msra.mxu3 %v2830_v13  ;;  %1012 = vmatpush.bf16.msrb.mxu1 %v2834_v17  ;;  %v3572_v13 = vld [vmem:[#allocation7 + $0x244] sm:$0xf]  ;;  %v2797_v17 = vld [vmem:[#allocation7 + $0x2a0] sm:$0xf] }
  0xce   :  { %v2754_v16 = vor.u32 %v3572_v13, %v2751_v15  ;;  %v2798_v20 = vor.u32 %v3585_v18, %v2797_v17  ;;  %v3636_v13 = vld [vmem:[#allocation5 + $0xc4] sm:$0xf] }
  0xd0   :  { %970 = vmatpush.bf16.msra.mxu2 %v2766_v54  ;;  %998 = vmatpush.bf16.msrb.mxu0 %v2770_v58  ;;  %v3565_v54 = vld [vmem:[#allocation7 + $0x204] sm:$0xf0]  ;;  %v2722_v58 = vor.u32 %v3564_v55, %v2719_v57  ;;  %v3631_v57 = vld [vmem:[#allocation5 + $0x94] sm:$0xf0] }
  0xd1   :  { %985 = vmatpush.bf16.msra.mxu3 %v2822_v48  ;;  %1013 = vmatpush.bf16.msrb.mxu1 %v2826_v50  ;;  %v3567_v48 = vld [vmem:[#allocation7 + $0x214] sm:$0xf0]  ;;  %v2718_v56 = vor.u32 %v3565_v54, %v2717_v53  ;;  %v3630_v53 = vld [vmem:[#allocation5 + $0x94] sm:$0xf]  ;;  %v2855_v54 = vld [vmem:[#allocation5 + $0x98] sm:$0xf0] }
  0xd2   :  { %v2726_v50 = vor.u32 %v3567_v48, %v2725_v47 }
  0xd4   :  { %971 = vmatpush.bf16.msra.mxu2 %v2758_v2  ;;  %999 = vmatpush.bf16.msrb.mxu0 %v2762_v4  ;;  %v2902_v2 = vor.u32 %v3643_v1, %v2901_v0  ;;  %v2898_v4 = vor.u32 %v3640_v61, %v2895_v63  ;;  %v2858_v61 = vor.u32 %v3630_v53, %v2855_v54  ;;  %v3628_v1 = vld [vmem:[#allocation5 + $0x84] sm:$0xf]  ;;  %v2941_v53 = vld [vmem:[#allocation7 + $0x340] sm:$0xf]  ;;  %v3605_v54 = vld [vmem:[#allocation7 + $0x344] sm:$0xf0] }
  0xd5   :  { %986 = vmatpush.bf16.msra.mxu3 %v2814_v59  ;;  %1014 = vmatpush.bf16.msrb.mxu1 %v2818_v62  ;;  %v3642_v59 = vld [vmem:[#allocation5 + $0xf4] sm:$0xf] }
  0xd6   :  { %v2906_v62 = vor.u32 %v3642_v59, %v2903_v60 }
  0xd8   :  { %972 = vmatpush.bf16.msra.mxu2 %v2750_v14  ;;  %1000 = vmatpush.bf16.msrb.mxu0 %v2754_v16  ;;  %v2879_v14 = vld [vmem:[#allocation5 + $0xc8] sm:$0xf0]  ;;  %v2877_v16 = vld [vmem:[#allocation5 + $0xc0] sm:$0xf] }
  0xd9   :  { %987 = vmatpush.bf16.msra.mxu3 %v2806_v7  ;;  %1015 = vmatpush.bf16.msrb.mxu1 %v2810_v10  ;;  %v2887_v7 = vld [vmem:[#allocation5 + $0xd8] sm:$0xf0]  ;;  %v3639_v10 = vld [vmem:[#allocation5 + $0xd4] sm:$0xf0] }
  0xda   :  { %v2890_v12 = vor.u32 %v3638_v6, %v2887_v7  ;;  %v2886_v15 = vor.u32 %v3639_v10, %v2885_v9  ;;  %v3031_v7 = vld [vmem:[#allocation7 + $0x3f8] sm:$0xf0]  ;;  %v3629_v9 = vld [vmem:[#allocation5 + $0x84] sm:$0xf0] }
  0xdd   :  { %988 = vmatpush.bf16.msra.mxu3 %v2798_v20  ;;  %v3029_v20 = vld [vmem:[#allocation7 + $0x3f0] sm:$0xf] }
 0x143   :  { %v482_v21 = vpop.f32.mrf.mxu0 }
 0x144   :  { %v496_v23 = vpop.f32.mrf.mxu1  ;;  %v483_v24 = vadd.f32 %v482_v21, %v282_v22  ;;  %v2799_v21 = vld [vmem:[#allocation7 + $0x2a8] sm:$0xf0] }
 0x146   :  { %v497_v29 = vadd.f32 %v496_v23, %v483_v24  ;;  %v2741_v23 = vld [vmem:[#allocation7 + $0x230] sm:$0xf]  ;;  %v3571_v24 = vld [vmem:[#allocation7 + $0x234] sm:$0xf0] }
 0x148   :  { %v502_v34 = vmax.f32 %v497_v29, 0.0  ;;  %v2789_v29 = vld [vmem:[#allocation7 + $0x290] sm:$0xf] }
 0x149   :  { %v454_v25 = vpop.f32.mrf.mxu2 }
 0x14a   :  { %v468_v27 = vpop.f32.mrf.mxu3  ;;  %v455_v32 = vadd.f32 %v454_v25, %v281_v26  ;;  %v3570_v25 = vld [vmem:[#allocation7 + $0x234] sm:$0xf] }
 0x14b   :  { %v484_v28 = vpop.f32.mrf.mxu0 }
 0x14c   :  { %v485_v30 = vadd.f32 %v484_v28, %v282_v22  ;;  %v498_v31 = vpop.f32.mrf.mxu1  ;;  %v469_v37 = vadd.f32 %v468_v27, %v455_v32  ;;  %v2802_v22 = vor.u32 %v3584_v19, %v2799_v21  ;;  %v2743_v27 = vld [vmem:[#allocation7 + $0x238] sm:$0xf0]  ;;  %v3637_v19 = vld [vmem:[#allocation5 + $0xc4] sm:$0xf0]  ;;  %v3627_v21 = vld [vmem:[#allocation7 + $0x3f4] sm:$0xf0] }
 0x14d   :  { %v2746_v28 = vor.u32 %v3570_v25, %v2743_v27  ;;  %v3021_v25 = vld [vmem:[#allocation7 + $0x3e0] sm:$0xf]  ;;  %v3634_v27 = vld [vmem:[#allocation5 + $0xb4] sm:$0xf] }
 0x14e   :  { %v499_v33 = vadd.f32 %v498_v31, %v485_v30  ;;  %v501_v42 = vmax.f32 %v469_v37, 0.0  ;;  %1016 = vmatpush.bf16.msrb.mxu1 %v2802_v22  ;;  %v3583_v30 = vld [vmem:[#allocation7 + $0x294] sm:$0xf0]  ;;  %v3582_v31 = vld [vmem:[#allocation7 + $0x294] sm:$0xf]  ;;  %v544_v22 = vperm.slane %v3990_v11, 1 }
 0x14f   :  { %v2790_v32 = vor.u32 %v3583_v30, %v2789_v29  ;;  %1001 = vmatpush.bf16.msrb.mxu0 %v2746_v28  ;;  %v3568_v37 = vld [vmem:[#allocation7 + $0x224] sm:$0xf]  ;;  %v2871_v28 = vld [vmem:[#allocation5 + $0xb8] sm:$0xf0]  ;;  %v2878_v29 = vor.u32 %v3637_v19, %v2877_v16  ;;  %v2869_v30 = vld [vmem:[#allocation5 + $0xb0] sm:$0xf] }
 0x150   :  { %v504_v35 = vmax.f32 %v499_v33, 0.0  ;;  %v2791_v33 = vld [vmem:[#allocation7 + $0x298] sm:$0xf0]  ;;  %v3023_v19 = vld [vmem:[#allocation7 + $0x3e8] sm:$0xf0] }
 0x151   :  { %v456_v36 = vpop.f32.mrf.mxu2  ;;  %989 = vmatpush.bf16.msra.mxu3 %v2790_v32  ;;  %v3635_v32 = vld [vmem:[#allocation5 + $0xb4] sm:$0xf0] }
 0x152   :  { %v506_v38 = vpack.c.bf16 %v504_v35, %v502_v34  ;;  %v457_v39 = vadd.f32 %v456_v36, %v281_v26  ;;  %v470_v40 = vpop.f32.mrf.mxu3  ;;  %v2742_v26 = vor.u32 %v3571_v24, %v2741_v23  ;;  %v2794_v34 = vor.u32 %v3582_v31, %v2791_v33  ;;  %v2733_v35 = vld [vmem:[#allocation7 + $0x220] sm:$0xf]  ;;  %v3569_v36 = vld [vmem:[#allocation7 + $0x224] sm:$0xf0]  ;;  %v2965_v33 = vld [vmem:[#allocation7 + $0x370] sm:$0xf] }
 0x153   :  { %v3030_v23 = vor.u32 %v3627_v21, %v3029_v20  ;;  %v2882_v24 = vor.u32 %v3636_v13, %v2879_v14 }
 0x154   :  { %v471_v41 = vadd.f32 %v470_v40, %v457_v39  ;;  %729 = vmatmul.bf16.vlgmr.msrb.gmra.mxu3 %v506_v38  ;;  %757 = vmatmul.bf16.vlgmr.msra.gmra.mxu1 %v506_v38  ;;  %v2734_v38 = vor.u32 %v3569_v36, %v2733_v35  ;;  %v2735_v39 = vld [vmem:[#allocation7 + $0x228] sm:$0xf0] }
 0x155   :  { %973 = vmatpush.bf16.msra.mxu2 %v2742_v26  ;;  %1017 = vmatpush.bf16.msrb.mxu1 %v2794_v34  ;;  %v2738_v40 = vor.u32 %v3568_v37, %v2735_v39  ;;  %v3625_v26 = vld [vmem:[#allocation7 + $0x3e4] sm:$0xf0]  ;;  %v3611_v34 = vld [vmem:[#allocation7 + $0x374] sm:$0xf0]  ;;  %v2874_v39 = vor.u32 %v3634_v27, %v2871_v28  ;;  %v3015_v27 = vld [vmem:[#allocation7 + $0x3d8] sm:$0xf0] }
 0x156   :  { %v503_v43 = vmax.f32 %v471_v41, 0.0  ;;  %v2781_v41 = vld [vmem:[#allocation7 + $0x280] sm:$0xf]  ;;  %v3022_v31 = vor.u32 %v3625_v26, %v3021_v25  ;;  %v2966_v36 = vor.u32 %v3611_v34, %v2965_v33  ;;  %v3622_v25 = vld [vmem:[#allocation7 + $0x3d4] sm:$0xf] }
 0x157   :  { %1002 = vmatpush.bf16.msrb.mxu0 %v2738_v40  ;;  %v543_v40 = vperm.slane %v3990_v11, 0  ;;  %v3610_v11 = vld [vmem:[#allocation7 + $0x374] sm:$0xf]  ;;  %v3018_v28 = vor.u32 %v3622_v25, %v3015_v27  ;;  %v2959_v33 = vld [vmem:[#allocation7 + $0x368] sm:$0xf0] }
 0x158   :  { %v505_v44 = vpack.c.bf16 %v503_v43, %v501_v42  ;;  %v3581_v42 = vld [vmem:[#allocation7 + $0x284] sm:$0xf0]  ;;  %v3580_v43 = vld [vmem:[#allocation7 + $0x284] sm:$0xf]  ;;  %v3005_v34 = vld [vmem:[#allocation7 + $0x3c0] sm:$0xf] }
 0x159   :  { %974 = vmatpush.bf16.msra.mxu2 %v2734_v38  ;;  %v2786_v46 = vor.u32 %v3580_v43, %v2783_v45  ;;  %v2870_v43 = vor.u32 %v3635_v32, %v2869_v30  ;;  %v2861_v45 = vld [vmem:[#allocation5 + $0xa0] sm:$0xf]  ;;  %v3609_v30 = vld [vmem:[#allocation7 + $0x364] sm:$0xf0]  ;;  %v2917_v25 = vld [vmem:[#allocation7 + $0x310] sm:$0xf] }
 0x15a   :  { %715 = vmatmul.bf16.vlgmr.msrb.gmra.mxu2 %v505_v44  ;;  %743 = vmatmul.bf16.vlgmr.msra.gmra.mxu0 %v505_v44  ;;  %v2782_v44 = vor.u32 %v3581_v42, %v2781_v41  ;;  %v3632_v41 = vld [vmem:[#allocation5 + $0xa4] sm:$0xf]  ;;  %v2863_v42 = vld [vmem:[#allocation5 + $0xa8] sm:$0xf0]  ;;  %v3598_v27 = vld [vmem:[#allocation7 + $0x314] sm:$0xf] }
 0x15b   :  { %1018 = vmatpush.bf16.msrb.mxu1 %v2786_v46  ;;  %1003 = vmatpush.bf16.msrb.mxu0 %v2730_v52  ;;  %v3633_v46 = vld [vmem:[#allocation5 + $0xa4] sm:$0xf0] }
 0x15c   :  { %990 = vmatpush.bf16.msra.mxu3 %v2782_v44  ;;  %v2862_v55 = vor.u32 %v3633_v46, %v2861_v45  ;;  %v2951_v45 = vld [vmem:[#allocation7 + $0x358] sm:$0xf0] }
 0x15d   :  { %975 = vmatpush.bf16.msra.mxu2 %v2726_v50  ;;  %v2866_v50 = vor.u32 %v3632_v41, %v2863_v42  ;;  %v2949_v41 = vld [vmem:[#allocation7 + $0x350] sm:$0xf]  ;;  %v3607_v42 = vld [vmem:[#allocation7 + $0x354] sm:$0xf0] }
 0x15f   :  { %1004 = vmatpush.bf16.msrb.mxu0 %v2722_v58  ;;  %1363 = vmatpush.bf16.msra.mxu1 %v3030_v23  ;;  %v3013_v23 = vld [vmem:[#allocation7 + $0x3d0] sm:$0xf] }
 0x160   :  { %1175 = vmatpush.bf16.msrb.mxu3 %v2906_v62 }
 0x161   :  { %976 = vmatpush.bf16.msra.mxu2 %v2718_v56  ;;  %v2853_v56 = vld [vmem:[#allocation5 + $0x90] sm:$0xf] }
 0x162   :  { %v2854_v3 = vor.u32 %v3631_v57, %v2853_v56  ;;  %v2942_v56 = vor.u32 %v3605_v54, %v2941_v53  ;;  %v2943_v57 = vld [vmem:[#allocation7 + $0x348] sm:$0xf0] }
 0x163   :  { %1364 = vmatpush.bf16.msra.mxu1 %v3022_v31  ;;  %1349 = vmatpush.bf16.msra.mxu0 %v2966_v36  ;;  %v3608_v31 = vld [vmem:[#allocation7 + $0x364] sm:$0xf] }
 0x164   :  { %1176 = vmatpush.bf16.msrb.mxu3 %v2898_v4  ;;  %v2962_v36 = vor.u32 %v3608_v31, %v2959_v33  ;;  %v2909_v31 = vld [vmem:[#allocation7 + $0x300] sm:$0xf]  ;;  %v3596_v33 = vld [vmem:[#allocation7 + $0x304] sm:$0xf] }
 0x165   :  { %1161 = vmatpush.bf16.msrb.mxu2 %v2902_v2  ;;  %v2847_v2 = vld [vmem:[#allocation5 + $0x88] sm:$0xf0] }
 0x166   :  { %v2850_v10 = vor.u32 %v3628_v1, %v2847_v2  ;;  %v2933_v1 = vld [vmem:[#allocation7 + $0x330] sm:$0xf]  ;;  %v3603_v2 = vld [vmem:[#allocation7 + $0x334] sm:$0xf0] }
 0x168   :  { %1177 = vmatpush.bf16.msrb.mxu3 %v2890_v12  ;;  %v2967_v12 = vld [vmem:[#allocation7 + $0x378] sm:$0xf0] }
 0x169   :  { %1162 = vmatpush.bf16.msrb.mxu2 %v2894_v8  ;;  %v2845_v8 = vld [vmem:[#allocation5 + $0x80] sm:$0xf]  ;;  %v2970_v20 = vor.u32 %v3610_v11, %v2967_v12  ;;  %v2983_v11 = vld [vmem:[#allocation7 + $0x398] sm:$0xf0] }
 0x16a   :  { %v2846_v16 = vor.u32 %v3629_v9, %v2845_v8  ;;  %v3615_v8 = vld [vmem:[#allocation7 + $0x394] sm:$0xf0]  ;;  %v3614_v9 = vld [vmem:[#allocation7 + $0x394] sm:$0xf] }
 0x16b   :  { %v2986_v12 = vor.u32 %v3614_v9, %v2983_v11  ;;  %v3675_v11 = vld [vmem:[#allocation7 + $0x4f4] sm:$0xf0] }
 0x16c   :  { %1178 = vmatpush.bf16.msrb.mxu3 %v2882_v24  ;;  %v3623_v24 = vld [vmem:[#allocation7 + $0x3d4] sm:$0xf0] }
 0x16d   :  { %1163 = vmatpush.bf16.msrb.mxu2 %v2886_v15  ;;  %v3034_v15 = vor.u32 %v3626_v5, %v3031_v7  ;;  %v3014_v26 = vor.u32 %v3623_v24, %v3013_v23  ;;  %v2935_v5 = vld [vmem:[#allocation7 + $0x338] sm:$0xf0]  ;;  %v2981_v7 = vld [vmem:[#allocation7 + $0x390] sm:$0xf]  ;;  %v2975_v23 = vld [vmem:[#allocation7 + $0x388] sm:$0xf0] }
 0x16f   :  { %1365 = vmatpush.bf16.msra.mxu1 %v3014_v26  ;;  %v3599_v26 = vld [vmem:[#allocation7 + $0x314] sm:$0xf0] }
 0x170   :  { %1179 = vmatpush.bf16.msrb.mxu3 %v2874_v39  ;;  %v3007_v39 = vld [vmem:[#allocation7 + $0x3c8] sm:$0xf0] }
 0x171   :  { %1164 = vmatpush.bf16.msrb.mxu2 %v2878_v29  ;;  %v2957_v29 = vld [vmem:[#allocation7 + $0x360] sm:$0xf] }
 0x172   :  { %v2958_v32 = vor.u32 %v3609_v30, %v2957_v29  ;;  %v2919_v29 = vld [vmem:[#allocation7 + $0x318] sm:$0xf0] }
 0x173   :  { %v2922_v30 = vor.u32 %v3598_v27, %v2919_v29  ;;  %v3653_v29 = vld [vmem:[#allocation7 + $0x444] sm:$0xf0] }
 0x174   :  { %1180 = vmatpush.bf16.msrb.mxu3 %v2866_v50  ;;  %1350 = vmatpush.bf16.msra.mxu0 %v2958_v32  ;;  %v3618_v50 = vld [vmem:[#allocation7 + $0x3b4] sm:$0xf]  ;;  %v3597_v32 = vld [vmem:[#allocation7 + $0x304] sm:$0xf0] }
 0x175   :  { %1165 = vmatpush.bf16.msrb.mxu2 %v2870_v43  ;;  %v3606_v43 = vld [vmem:[#allocation7 + $0x354] sm:$0xf] }
 0x176   :  { %v2954_v46 = vor.u32 %v3606_v43, %v2951_v45  ;;  %v803_v43 = vld [vmem:[#allocation8 + $0x6] sm:$0x3]  ;;  %v3657_v45 = vld [vmem:[#allocation7 + $0x464] sm:$0xf0] }
 0x178   :  { %1181 = vmatpush.bf16.msrb.mxu3 %v2858_v61  ;;  %v3616_v61 = vld [vmem:[#allocation7 + $0x3a4] sm:$0xf] }
 0x179   :  { %1166 = vmatpush.bf16.msrb.mxu2 %v2862_v55  ;;  %v3604_v55 = vld [vmem:[#allocation7 + $0x344] sm:$0xf] }
 0x17c   :  { %1182 = vmatpush.bf16.msrb.mxu3 %v2850_v10  ;;  %v2982_v10 = vor.u32 %v3615_v8, %v2981_v7 }
 0x17d   :  { %1167 = vmatpush.bf16.msrb.mxu2 %v2854_v3  ;;  %v3602_v3 = vld [vmem:[#allocation7 + $0x334] sm:$0xf] }
 0x181   :  { %1168 = vmatpush.bf16.msrb.mxu2 %v2846_v16 }
 0x1d1   :  { %v758_v17 = vpop.f32.mrf.mxu1 }
 0x1d7   :  { %v744_v18 = vpop.f32.mrf.mxu0  ;;  %v730_v37 = vpop.f32.mrf.mxu3 }
 0x1d8   :  { %v745_v35 = vadd.f32 %v744_v18, %v544_v22  ;;  %v3624_v18 = vld [vmem:[#allocation7 + $0x3e4] sm:$0xf] }
 0x1d9   :  { %v760_v49 = vpop.f32.mrf.mxu1  ;;  %v3026_v21 = vor.u32 %v3624_v18, %v3023_v19  ;;  %v2973_v19 = vld [vmem:[#allocation7 + $0x380] sm:$0xf] }
 0x1da   :  { %v759_v47 = vadd.f32 %v758_v17, %v745_v35  ;;  %v3621_v35 = vld [vmem:[#allocation7 + $0x3c4] sm:$0xf0] }
 0x1dc   :  { %v764_v58 = vmax.f32 %v759_v47, 0.0  ;;  %v2997_v47 = vld [vmem:[#allocation7 + $0x3b0] sm:$0xf] }
 0x1dd   :  { %v716_v38 = vpop.f32.mrf.mxu2 }
 0x1de   :  { %v717_v51 = vadd.f32 %v716_v38, %v543_v40  ;;  %v3620_v38 = vld [vmem:[#allocation7 + $0x3c4] sm:$0xf] }
 0x1df   :  { %v746_v44 = vpop.f32.mrf.mxu0  ;;  %v732_v4 = vpop.f32.mrf.mxu3 }
 0x1e0   :  { %v747_v48 = vadd.f32 %v746_v44, %v544_v22  ;;  %v731_v62 = vadd.f32 %v730_v37, %v717_v51  ;;  %v3769_v22 = vld [vmem:[#allocation2] sm:$0xff]  ;;  %v3006_v37 = vor.u32 %v3621_v35, %v3005_v34  ;;  %v2950_v44 = vor.u32 %v3607_v42, %v2949_v41  ;;  %v2911_v35 = vld [vmem:[#allocation7 + $0x308] sm:$0xf0] }
 0x1e1   :  { %v2999_v51 = vld [vmem:[#allocation7 + $0x3b8] sm:$0xf0]  ;;  %v2910_v34 = vor.u32 %v3597_v32, %v2909_v31  ;;  %v3071_v32 = vld [vmem:[#allocation7 + $0x448] sm:$0xf0] }
 0x1e2   :  { %v761_v52 = vadd.f32 %v760_v49, %v747_v48  ;;  %v763_v13 = vmax.f32 %v731_v62, 0.0  ;;  %1366 = vmatpush.bf16.msra.mxu1 %v3006_v37  ;;  %v3619_v48 = vld [vmem:[#allocation7 + $0x3b4] sm:$0xf0]  ;;  %1351 = vmatpush.bf16.msra.mxu0 %v2950_v44  ;;  %v3093_v37 = vld [vmem:[#allocation7 + $0x470] sm:$0xf] }
 0x1e3   :  { %v2998_v49 = vor.u32 %v3619_v48, %v2997_v47  ;;  %v3095_v41 = vld [vmem:[#allocation7 + $0x478] sm:$0xf0]  ;;  %v3085_v44 = vld [vmem:[#allocation7 + $0x460] sm:$0xf]  ;;  %v3087_v48 = vld [vmem:[#allocation7 + $0x468] sm:$0xf0] }
 0x1e4   :  { %v766_v59 = vmax.f32 %v761_v52, 0.0  ;;  %v3002_v52 = vor.u32 %v3618_v50, %v2999_v51  ;;  %v3086_v47 = vor.u32 %v3657_v45, %v3085_v44  ;;  %v3063_v44 = vld [vmem:[#allocation7 + $0x438] sm:$0xf0] }
 0x1e5   :  { %v718_v60 = vpop.f32.mrf.mxu2 }
 0x1e6   :  { %v768_v63 = vpack.c.bf16 %v766_v59, %v764_v58  ;;  %v719_v0 = vadd.f32 %v718_v60, %v543_v40  ;;  %v3010_v40 = vor.u32 %v3620_v38, %v3007_v39  ;;  %1367 = vmatpush.bf16.msra.mxu1 %v2998_v49  ;;  %v2946_v58 = vor.u32 %v3604_v55, %v2943_v57  ;;  %v2989_v59 = vld [vmem:[#allocation7 + $0x3a0] sm:$0xf]  ;;  %v3617_v60 = vld [vmem:[#allocation7 + $0x3a4] sm:$0xf0]  ;;  %v3659_v38 = vld [vmem:[#allocation7 + $0x474] sm:$0xf0] }
 0x1e7   :  { %1352 = vmatpush.bf16.msra.mxu0 %v2942_v56  ;;  %v2990_v62 = vor.u32 %v3617_v60, %v2989_v59  ;;  %v3658_v39 = vld [vmem:[#allocation7 + $0x474] sm:$0xf]  ;;  %v805_v56 = vperm.slane %v803_v43, 0 }
 0x1e8   :  { %v733_v6 = vadd.f32 %v732_v4, %v719_v0  ;;  %991 = vmatmul.bf16.vlgmr.msra.gmra.mxu3 %v768_v63  ;;  %1019 = vmatmul.bf16.vlgmr.msrb.gmra.mxu1 %v768_v63  ;;  %v2991_v63 = vld [vmem:[#allocation7 + $0x3a8] sm:$0xf0]  ;;  %v2934_v4 = vor.u32 %v3603_v2, %v2933_v1  ;;  %v3098_v42 = vor.u32 %v3658_v39, %v3095_v41  ;;  %v3651_v41 = vld [vmem:[#allocation7 + $0x434] sm:$0xf0] }
 0x1e9   :  { %1391 = vmatpush.bf16.msra.mxu3 %v3034_v15  ;;  %v2994_v0 = vor.u32 %v3616_v61, %v2991_v63  ;;  %v3600_v15 = vld [vmem:[#allocation7 + $0x324] sm:$0xf] }
 0x1ea   :  { %v765_v14 = vmax.f32 %v733_v6, 0.0  ;;  %1368 = vmatpush.bf16.msra.mxu1 %v2990_v62  ;;  %v2938_v6 = vor.u32 %v3602_v3, %v2935_v5 }
 0x1eb   :  { %1353 = vmatpush.bf16.msra.mxu0 %v2934_v4 }
 0x1ec   :  { %v767_v17 = vpack.c.bf16 %v765_v14, %v763_v13  ;;  %v2925_v13 = vld [vmem:[#allocation7 + $0x320] sm:$0xf]  ;;  %v3601_v14 = vld [vmem:[#allocation7 + $0x324] sm:$0xf0] }
 0x1ed   :  { %1392 = vmatpush.bf16.msra.mxu3 %v3026_v21  ;;  %v2926_v16 = vor.u32 %v3601_v14, %v2925_v13  ;;  %v3612_v21 = vld [vmem:[#allocation7 + $0x384] sm:$0xf]  ;;  %v3159_v14 = vld [vmem:[#allocation7 + $0x4f8] sm:$0xf0] }
 0x1ee   :  { %977 = vmatmul.bf16.vlgmr.msra.gmra.mxu2 %v767_v17  ;;  %1005 = vmatmul.bf16.vlgmr.msrb.gmra.mxu0 %v767_v17  ;;  %v2927_v17 = vld [vmem:[#allocation7 + $0x328] sm:$0xf0]  ;;  %v2978_v24 = vor.u32 %v3612_v21, %v2975_v23  ;;  %v3149_v21 = vld [vmem:[#allocation7 + $0x4e0] sm:$0xf] }
 0x1ef   :  { %1377 = vmatpush.bf16.msra.mxu2 %v2970_v20  ;;  %1369 = vmatpush.bf16.msra.mxu1 %v2982_v10  ;;  %v2930_v18 = vor.u32 %v3600_v15, %v2927_v17  ;;  %v3613_v20 = vld [vmem:[#allocation7 + $0x384] sm:$0xf0]  ;;  %v3157_v10 = vld [vmem:[#allocation7 + $0x4f0] sm:$0xf]  ;;  %v3655_v17 = vld [vmem:[#allocation7 + $0x454] sm:$0xf0] }
 0x1f0   :  { %1354 = vmatpush.bf16.msra.mxu0 %v2926_v16  ;;  %v3158_v13 = vor.u32 %v3675_v11, %v3157_v10  ;;  %v3077_v16 = vld [vmem:[#allocation7 + $0x450] sm:$0xf]  ;;  %v3119_v10 = vld [vmem:[#allocation7 + $0x4a8] sm:$0xf0] }
 0x1f1   :  { %1393 = vmatpush.bf16.msra.mxu3 %v3018_v28  ;;  %v2918_v28 = vor.u32 %v3599_v26, %v2917_v25  ;;  %v3672_v25 = vld [vmem:[#allocation7 + $0x4e4] sm:$0xf]  ;;  %v3151_v26 = vld [vmem:[#allocation7 + $0x4e8] sm:$0xf0] }
 0x1f2   :  { %v3154_v27 = vor.u32 %v3672_v25, %v3151_v26  ;;  %v3101_v26 = vld [vmem:[#allocation7 + $0x480] sm:$0xf] }
 0x1f3   :  { %1378 = vmatpush.bf16.msra.mxu2 %v2962_v36  ;;  %v2914_v36 = vor.u32 %v3596_v33, %v2911_v35  ;;  %v3671_v35 = vld [vmem:[#allocation7 + $0x4d4] sm:$0xf0] }
 0x1f4   :  { %1355 = vmatpush.bf16.msra.mxu0 %v2918_v28  ;;  %v3069_v28 = vld [vmem:[#allocation7 + $0x440] sm:$0xf] }
 0x1f5   :  { %1394 = vmatpush.bf16.msra.mxu3 %v3010_v40  ;;  %v3094_v40 = vor.u32 %v3659_v38, %v3093_v37  ;;  %v3070_v31 = vor.u32 %v3653_v29, %v3069_v28  ;;  %v3143_v38 = vld [vmem:[#allocation7 + $0x4d8] sm:$0xf0]  ;;  %v3660_v28 = vld [vmem:[#allocation7 + $0x484] sm:$0xf] }
 0x1f7   :  { %1379 = vmatpush.bf16.msra.mxu2 %v2954_v46  ;;  %v3656_v46 = vld [vmem:[#allocation7 + $0x464] sm:$0xf] }
 0x1f8   :  { %1183 = vmatmul.bf16.vlgmr.msrb.gmra.mxu3 %v3769_v22  ;;  %1356 = vmatpush.bf16.msra.mxu0 %v2910_v34  ;;  %v3090_v51 = vor.u32 %v3656_v46, %v3087_v48  ;;  %v3141_v34 = vld [vmem:[#allocation7 + $0x4d0] sm:$0xf]  ;;  %v3133_v46 = vld [vmem:[#allocation7 + $0x4c0] sm:$0xf] }
 0x1f9   :  { %1395 = vmatpush.bf16.msra.mxu3 %v3002_v52  ;;  %v806_v52 = vperm.slane %v803_v43, 1  ;;  %v3142_v37 = vor.u32 %v3671_v35, %v3141_v34  ;;  %v3690_v34 = vld [vmem:[#allocation7 + $0x574] sm:$0xf] }
 0x1fb   :  { %1380 = vmatpush.bf16.msra.mxu2 %v2946_v58 }
 0x1fc   :  { %1622 = vmatpush.bf16.msrb.mxu0 %v3094_v40  ;;  %v3061_v40 = vld [vmem:[#allocation7 + $0x430] sm:$0xf] }
 0x1fd   :  { %1396 = vmatpush.bf16.msra.mxu3 %v2994_v0  ;;  %v3062_v43 = vor.u32 %v3651_v41, %v3061_v40  ;;  %v3688_v40 = vld [vmem:[#allocation7 + $0x564] sm:$0xf]  ;;  %v3215_v41 = vld [vmem:[#allocation7 + $0x568] sm:$0xf0] }
 0x1fe   :  { %1169 = vmatmul.bf16.vlgmr.msrb.gmra.mxu2 %v3769_v22  ;;  %v2974_v22 = vor.u32 %v3613_v20, %v2973_v19  ;;  %v3078_v19 = vor.u32 %v3655_v17, %v3077_v16  ;;  %v3079_v20 = vld [vmem:[#allocation7 + $0x458] sm:$0xf0]  ;;  %v3039_v16 = vld [vmem:[#allocation7 + $0x408] sm:$0xf0] }
 0x1ff   :  { %1381 = vmatpush.bf16.msra.mxu2 %v2938_v6 }
 0x200   :  { %1370 = vmatpush.bf16.msra.mxu1 %v2974_v22  ;;  %1623 = vmatpush.bf16.msrb.mxu0 %v3086_v47  ;;  %v3673_v22 = vld [vmem:[#allocation7 + $0x4e4] sm:$0xf0] }
 0x201   :  { %1397 = vmatpush.bf16.msra.mxu3 %v2986_v12  ;;  %v3674_v12 = vld [vmem:[#allocation7 + $0x4f4] sm:$0xf]  ;;  %v3669_v47 = vld [vmem:[#allocation7 + $0x4c4] sm:$0xf0] }
 0x202   :  { %v3162_v15 = vor.u32 %v3674_v12, %v3159_v14  ;;  %v3134_v48 = vor.u32 %v3669_v47, %v3133_v46  ;;  %v3037_v12 = vld [vmem:[#allocation7 + $0x400] sm:$0xf]  ;;  %v3644_v14 = vld [vmem:[#allocation7 + $0x404] sm:$0xf]  ;;  %v3706_v46 = vld [vmem:[#allocation7 + $0x5f4] sm:$0xf] }
 0x203   :  { %1382 = vmatpush.bf16.msra.mxu2 %v2930_v18  ;;  %v3654_v18 = vld [vmem:[#allocation7 + $0x454] sm:$0xf]  ;;  %v3042_v17 = vor.u32 %v3644_v14, %v3039_v16  ;;  %v3287_v47 = vld [vmem:[#allocation7 + $0x5f8] sm:$0xf0] }
 0x204   :  { %1636 = vmatpush.bf16.msrb.mxu1 %v3158_v13  ;;  %v3082_v23 = vor.u32 %v3654_v18, %v3079_v20  ;;  %1624 = vmatpush.bf16.msrb.mxu0 %v3078_v19  ;;  %v3645_v13 = vld [vmem:[#allocation7 + $0x404] sm:$0xf0]  ;;  %v3109_v18 = vld [vmem:[#allocation7 + $0x490] sm:$0xf]  ;;  %v3663_v19 = vld [vmem:[#allocation7 + $0x494] sm:$0xf0] }
 0x205   :  { %1398 = vmatpush.bf16.msra.mxu3 %v2978_v24  ;;  %v3150_v24 = vor.u32 %v3673_v22, %v3149_v21  ;;  %v3662_v20 = vld [vmem:[#allocation7 + $0x494] sm:$0xf]  ;;  %v3110_v21 = vor.u32 %v3663_v19, %v3109_v18  ;;  %v3111_v22 = vld [vmem:[#allocation7 + $0x498] sm:$0xf0] }
 0x207   :  { %1383 = vmatpush.bf16.msra.mxu2 %v2922_v30  ;;  %v3652_v30 = vld [vmem:[#allocation7 + $0x444] sm:$0xf] }
 0x208   :  { %1637 = vmatpush.bf16.msrb.mxu1 %v3150_v24  ;;  %v3074_v33 = vor.u32 %v3652_v30, %v3071_v32  ;;  %1625 = vmatpush.bf16.msrb.mxu0 %v3070_v31  ;;  %v3114_v24 = vor.u32 %v3662_v20, %v3111_v22  ;;  %v3103_v30 = vld [vmem:[#allocation7 + $0x488] sm:$0xf0]  ;;  %v3221_v32 = vld [vmem:[#allocation7 + $0x570] sm:$0xf] }
 0x209   :  { %1664 = vmatpush.bf16.msrb.mxu3 %v3162_v15  ;;  %v3038_v15 = vor.u32 %v3645_v13, %v3037_v12  ;;  %v3106_v31 = vor.u32 %v3660_v28, %v3103_v30  ;;  %v3685_v30 = vld [vmem:[#allocation7 + $0x544] sm:$0xf0] }
 0x20b   :  { %1384 = vmatpush.bf16.msra.mxu2 %v2914_v36  ;;  %v3670_v36 = vld [vmem:[#allocation7 + $0x4d4] sm:$0xf] }
 0x20c   :  { %v3146_v39 = vor.u32 %v3670_v36, %v3143_v38  ;;  %1638 = vmatpush.bf16.msrb.mxu1 %v3142_v37  ;;  %1626 = vmatpush.bf16.msrb.mxu0 %v3062_v43  ;;  %v3223_v36 = vld [vmem:[#allocation7 + $0x578] sm:$0xf0]  ;;  %v3213_v37 = vld [vmem:[#allocation7 + $0x560] sm:$0xf]  ;;  %v3689_v38 = vld [vmem:[#allocation7 + $0x564] sm:$0xf0] }
 0x20d   :  { %1665 = vmatpush.bf16.msrb.mxu3 %v3154_v27  ;;  %v3661_v27 = vld [vmem:[#allocation7 + $0x484] sm:$0xf0] }
 0x20e   :  { %v3102_v29 = vor.u32 %v3661_v27, %v3101_v26  ;;  %v3279_v27 = vld [vmem:[#allocation7 + $0x5e8] sm:$0xf0] }
 0x20f   :  { %1650 = vmatpush.bf16.msrb.mxu2 %v3098_v42  ;;  %v3650_v42 = vld [vmem:[#allocation7 + $0x434] sm:$0xf] }
 0x210   :  { %v3066_v45 = vor.u32 %v3650_v42, %v3063_v44  ;;  %1639 = vmatpush.bf16.msrb.mxu1 %v3134_v48  ;;  %v3285_v42 = vld [vmem:[#allocation7 + $0x5f0] sm:$0xf]  ;;  %v3214_v44 = vor.u32 %v3689_v38, %v3213_v37  ;;  %v3218_v48 = vor.u32 %v3688_v40, %v3215_v41  ;;  %v3702_v38 = vld [vmem:[#allocation7 + $0x5d4] sm:$0xf] }
 0x211   :  { %1666 = vmatpush.bf16.msrb.mxu3 %v3146_v39  ;;  %v3226_v39 = vor.u32 %v3690_v34, %v3223_v36  ;;  %v3269_v34 = vld [vmem:[#allocation7 + $0x5d0] sm:$0xf] }
 0x212   :  { %v3189_v41 = vld [vmem:[#allocation7 + $0x530] sm:$0xf] }
 0x213   :  { %1651 = vmatpush.bf16.msrb.mxu2 %v3090_v51 }
 0x217   :  { %1652 = vmatpush.bf16.msrb.mxu2 %v3082_v23 }
 0x21b   :  { %1653 = vmatpush.bf16.msrb.mxu2 %v3074_v33  ;;  %v3691_v33 = vld [vmem:[#allocation7 + $0x574] sm:$0xf0] }
 0x21c   :  { %v3222_v35 = vor.u32 %v3691_v33, %v3221_v32  ;;  %v3199_v33 = vld [vmem:[#allocation7 + $0x548] sm:$0xf0] }
 0x21f   :  { %1654 = vmatpush.bf16.msrb.mxu2 %v3066_v45  ;;  %v3707_v45 = vld [vmem:[#allocation7 + $0x5f4] sm:$0xf0] }
 0x265   :  { %v1020_v49 = vpop.f32.mrf.mxu1 }
 0x26b   :  { %v1006_v50 = vpop.f32.mrf.mxu0  ;;  %v992_v54 = vpop.f32.mrf.mxu3 }
 0x26c   :  { %v1007_v53 = vadd.f32 %v1006_v50, %v806_v52  ;;  %v3135_v50 = vld [vmem:[#allocation7 + $0x4c8] sm:$0xf0] }
 0x26d   :  { %v1022_v60 = vpop.f32.mrf.mxu1 }
 0x26e   :  { %v1021_v58 = vadd.f32 %v1020_v49, %v1007_v53  ;;  %v3668_v49 = vld [vmem:[#allocation7 + $0x4c4] sm:$0xf]  ;;  %v3649_v53 = vld [vmem:[#allocation7 + $0x424] sm:$0xf0] }
 0x26f   :  { %v3138_v51 = vor.u32 %v3668_v49, %v3135_v50  ;;  %v3286_v49 = vor.u32 %v3707_v45, %v3285_v42  ;;  %v3290_v50 = vor.u32 %v3706_v46, %v3287_v47  ;;  %v3683_v42 = vld [vmem:[#allocation7 + $0x534] sm:$0xf0]  ;;  %v3191_v45 = vld [vmem:[#allocation7 + $0x538] sm:$0xf0]  ;;  %v3261_v47 = vld [vmem:[#allocation7 + $0x5c0] sm:$0xf] }
 0x270   :  { %v1026_v63 = vmax.f32 %v1021_v58, 0.0  ;;  %v3125_v58 = vld [vmem:[#allocation7 + $0x4b0] sm:$0xf] }
 0x271   :  { %v978_v55 = vpop.f32.mrf.mxu2  ;;  %1667 = vmatpush.bf16.msrb.mxu3 %v3138_v51  ;;  %v3205_v51 = vld [vmem:[#allocation7 + $0x550] sm:$0xf] }
 0x272   :  { %v979_v61 = vadd.f32 %v978_v55, %v805_v56 }
 0x273   :  { %v1008_v57 = vpop.f32.mrf.mxu0  ;;  %v994_v5 = vpop.f32.mrf.mxu3 }
 0x274   :  { %v1009_v59 = vadd.f32 %v1008_v57, %v806_v52  ;;  %v993_v2 = vadd.f32 %v992_v54, %v979_v61  ;;  %v3053_v52 = vld [vmem:[#allocation7 + $0x420] sm:$0xf]  ;;  %v3648_v54 = vld [vmem:[#allocation7 + $0x424] sm:$0xf] }
 0x275   :  { %v3054_v55 = vor.u32 %v3649_v53, %v3053_v52  ;;  %v3687_v52 = vld [vmem:[#allocation7 + $0x554] sm:$0xf0] }
 0x276   :  { %v1023_v62 = vadd.f32 %v1022_v60, %v1009_v59  ;;  %v1025_v7 = vmax.f32 %v993_v2, 0.0  ;;  %v3667_v59 = vld [vmem:[#allocation7 + $0x4b4] sm:$0xf0]  ;;  %v3666_v60 = vld [vmem:[#allocation7 + $0x4b4] sm:$0xf] }
 0x277   :  { %1627 = vmatpush.bf16.msrb.mxu0 %v3054_v55  ;;  %v3126_v61 = vor.u32 %v3667_v59, %v3125_v58  ;;  %v3646_v2 = vld [vmem:[#allocation7 + $0x414] sm:$0xf]  ;;  %v3207_v55 = vld [vmem:[#allocation7 + $0x558] sm:$0xf0]  ;;  %v3206_v58 = vor.u32 %v3687_v52, %v3205_v51  ;;  %v3263_v51 = vld [vmem:[#allocation7 + $0x5c8] sm:$0xf0] }
 0x278   :  { %v1028_v0 = vmax.f32 %v1023_v62, 0.0  ;;  %v3127_v62 = vld [vmem:[#allocation7 + $0x4b8] sm:$0xf0] }
 0x279   :  { %v980_v1 = vpop.f32.mrf.mxu2  ;;  %1640 = vmatpush.bf16.msrb.mxu1 %v3126_v61  ;;  %v1406_v61 = vld [vmem:[#allocation8 + $0x8] sm:$0x3] }
 0x27a   :  { %v1030_v3 = vpack.c.bf16 %v1028_v0, %v1026_v63  ;;  %v981_v4 = vadd.f32 %v980_v1, %v805_v56  ;;  %v3055_v56 = vld [vmem:[#allocation7 + $0x428] sm:$0xf0]  ;;  %v3130_v63 = vor.u32 %v3666_v60, %v3127_v62  ;;  %v3045_v0 = vld [vmem:[#allocation7 + $0x410] sm:$0xf]  ;;  %v3647_v1 = vld [vmem:[#allocation7 + $0x414] sm:$0xf0] }
 0x27b   :  { %v3058_v57 = vor.u32 %v3648_v54, %v3055_v56  ;;  %v1184_v23 = vpop.f32.mrf.mxu3  ;;  %v3686_v54 = vld [vmem:[#allocation7 + $0x554] sm:$0xf] }
 0x27c   :  { %v995_v6 = vadd.f32 %v994_v5, %v981_v4  ;;  %1371 = vmatmul.bf16.vlgmr.msra.gmra.mxu1 %v1030_v3  ;;  %1399 = vmatmul.bf16.vlgmr.msra.gmra.mxu3 %v1030_v3  ;;  %v3046_v3 = vor.u32 %v3647_v1, %v3045_v0  ;;  %v3047_v4 = vld [vmem:[#allocation7 + $0x418] sm:$0xf0]  ;;  %v3210_v59 = vor.u32 %v3686_v54, %v3207_v55  ;;  %v1408_v1 = vperm.slane %v1406_v61, 0  ;;  %v3681_v54 = vld [vmem:[#allocation7 + $0x524] sm:$0xf0] }
 0x27d   :  { %1655 = vmatpush.bf16.msrb.mxu2 %v3058_v57  ;;  %1668 = vmatpush.bf16.msrb.mxu3 %v3130_v63  ;;  %v3050_v5 = vor.u32 %v3646_v2, %v3047_v4  ;;  %v3680_v55 = vld [vmem:[#allocation7 + $0x524] sm:$0xf] }
 0x27e   :  { %v1027_v8 = vmax.f32 %v995_v6, 0.0  ;;  %v3117_v6 = vld [vmem:[#allocation7 + $0x4a0] sm:$0xf]  ;;  %1628 = vmatpush.bf16.msrb.mxu0 %v3046_v3 }
 0x280   :  { %v1029_v9 = vpack.c.bf16 %v1027_v8, %v1025_v7  ;;  %v3665_v7 = vld [vmem:[#allocation7 + $0x4a4] sm:$0xf0]  ;;  %v3664_v8 = vld [vmem:[#allocation7 + $0x4a4] sm:$0xf] }
 0x281   :  { %1656 = vmatpush.bf16.msrb.mxu2 %v3050_v5  ;;  %v3122_v11 = vor.u32 %v3664_v8, %v3119_v10  ;;  %v1170_v25 = vpop.f32.mrf.mxu2 }
 0x282   :  { %1357 = vmatmul.bf16.vlgmr.msra.gmra.mxu0 %v1029_v9  ;;  %1385 = vmatmul.bf16.vlgmr.msra.gmra.mxu2 %v1029_v9  ;;  %v3118_v9 = vor.u32 %v3665_v7, %v3117_v6 }
 0x283   :  { %1669 = vmatpush.bf16.msrb.mxu3 %v3122_v11  ;;  %1629 = vmatpush.bf16.msrb.mxu0 %v3038_v15  ;;  %v1186_v43 = vpop.f32.mrf.mxu3 }
 0x284   :  { %1641 = vmatpush.bf16.msrb.mxu1 %v3118_v9  ;;  %v1409_v9 = vperm.slane %v1406_v61, 1  ;;  %v3698_v61 = vld [vmem:[#allocation7 + $0x5b4] sm:$0xf] }
 0x285   :  { %1657 = vmatpush.bf16.msrb.mxu2 %v3042_v17 }
 0x287   :  { %1670 = vmatpush.bf16.msrb.mxu3 %v3114_v24  ;;  %1884 = vmatpush.bf16.msra.mxu0 %v3222_v35  ;;  %v3705_v24 = vld [vmem:[#allocation7 + $0x5e4] sm:$0xf0]  ;;  %v3703_v35 = vld [vmem:[#allocation7 + $0x5d4] sm:$0xf0] }
 0x288   :  { %1642 = vmatpush.bf16.msrb.mxu1 %v3110_v21  ;;  %v3270_v37 = vor.u32 %v3703_v35, %v3269_v34  ;;  %v3351_v35 = vld [vmem:[#allocation7 + $0x678] sm:$0xf0] }
 0x289   :  { %1912 = vmatpush.bf16.msra.mxu2 %v3226_v39  ;;  %v1172_v53 = vpop.f32.mrf.mxu2  ;;  %v3271_v39 = vld [vmem:[#allocation7 + $0x5d8] sm:$0xf0] }
 0x28a   :  { %v3274_v40 = vor.u32 %v3702_v38, %v3271_v39  ;;  %v3720_v39 = vld [vmem:[#allocation7 + $0x664] sm:$0xf] }
 0x28b   :  { %1671 = vmatpush.bf16.msrb.mxu3 %v3106_v31  ;;  %1885 = vmatpush.bf16.msra.mxu0 %v3214_v44  ;;  %v3684_v31 = vld [vmem:[#allocation7 + $0x544] sm:$0xf]  ;;  %v3190_v44 = vor.u32 %v3683_v42, %v3189_v41  ;;  %v3413_v41 = vld [vmem:[#allocation7 + $0x6f0] sm:$0xf] }
 0x28c   :  { %1643 = vmatpush.bf16.msrb.mxu1 %v3102_v29  ;;  %v3197_v29 = vld [vmem:[#allocation7 + $0x540] sm:$0xf]  ;;  %v3202_v36 = vor.u32 %v3684_v31, %v3199_v33  ;;  %v3349_v31 = vld [vmem:[#allocation7 + $0x670] sm:$0xf]  ;;  %v3722_v33 = vld [vmem:[#allocation7 + $0x674] sm:$0xf] }
 0x28d   :  { %1913 = vmatpush.bf16.msra.mxu2 %v3218_v48  ;;  %v3198_v32 = vor.u32 %v3685_v30, %v3197_v29  ;;  %v3701_v48 = vld [vmem:[#allocation7 + $0x5c4] sm:$0xf0]  ;;  %v3231_v29 = vld [vmem:[#allocation7 + $0x588] sm:$0xf0]  ;;  %v3354_v38 = vor.u32 %v3722_v33, %v3351_v35  ;;  %v3715_v35 = vld [vmem:[#allocation7 + $0x634] sm:$0xf0] }
 0x28f   :  { %1926 = vmatpush.bf16.msra.mxu3 %v3290_v50  ;;  %1886 = vmatpush.bf16.msra.mxu0 %v3206_v58  ;;  %v3700_v50 = vld [vmem:[#allocation7 + $0x5c4] sm:$0xf] }
 0x290   :  { %1898 = vmatpush.bf16.msra.mxu1 %v3286_v49  ;;  %v3262_v49 = vor.u32 %v3701_v48, %v3261_v47  ;;  %v3266_v52 = vor.u32 %v3700_v50, %v3263_v51  ;;  %v3719_v50 = vld [vmem:[#allocation7 + $0x654] sm:$0xf0] }
 0x291   :  { %1914 = vmatpush.bf16.msra.mxu2 %v3210_v59  ;;  %v3253_v59 = vld [vmem:[#allocation7 + $0x5b0] sm:$0xf] }
 0x293   :  { %1887 = vmatpush.bf16.msra.mxu0 %v3198_v32  ;;  %v3723_v32 = vld [vmem:[#allocation7 + $0x674] sm:$0xf0] }
 0x294   :  { %v3350_v34 = vor.u32 %v3723_v32, %v3349_v31  ;;  %v3734_v31 = vld [vmem:[#allocation7 + $0x6d4] sm:$0xf]  ;;  %v3399_v32 = vld [vmem:[#allocation7 + $0x6d8] sm:$0xf0] }
 0x295   :  { %1915 = vmatpush.bf16.msra.mxu2 %v3202_v36  ;;  %v3341_v36 = vld [vmem:[#allocation7 + $0x660] sm:$0xf]  ;;  %v3402_v33 = vor.u32 %v3734_v31, %v3399_v32 }
 0x297   :  { %1888 = vmatpush.bf16.msra.mxu0 %v3190_v44  ;;  %v3738_v44 = vld [vmem:[#allocation7 + $0x6f4] sm:$0xf] }
 0x2f9   :  { %v1372_v56 = vpop.f32.mrf.mxu1 }
 0x2ff   :  { %v1358_v57 = vpop.f32.mrf.mxu0  ;;  %v1400_v62 = vpop.f32.mrf.mxu3 }
 0x300   :  { %v1359_v60 = vadd.f32 %v1358_v57, %v1170_v25  ;;  %v3704_v25 = vld [vmem:[#allocation7 + $0x5e4] sm:$0xf]  ;;  %v3183_v57 = vld [vmem:[#allocation7 + $0x528] sm:$0xf0] }
 0x301   :  { %v1374_v5 = vpop.f32.mrf.mxu1  ;;  %v3282_v28 = vor.u32 %v3704_v25, %v3279_v27  ;;  %v3186_v58 = vor.u32 %v3680_v55, %v3183_v57  ;;  %v3229_v25 = vld [vmem:[#allocation7 + $0x580] sm:$0xf]  ;;  %v3692_v27 = vld [vmem:[#allocation7 + $0x584] sm:$0xf] }
 0x302   :  { %v1373_v0 = vadd.f32 %v1372_v56, %v1359_v60  ;;  %v3699_v60 = vld [vmem:[#allocation7 + $0x5b4] sm:$0xf0]  ;;  %v3234_v30 = vor.u32 %v3692_v27, %v3231_v29  ;;  %v3397_v27 = vld [vmem:[#allocation7 + $0x6d0] sm:$0xf] }
 0x303   :  { %1927 = vmatpush.bf16.msra.mxu3 %v3282_v28 }
 0x304   :  { %v1412_v6 = vadd.f32 %v1408_v1, %v1373_v0 }
 0x305   :  { %v1386_v63 = vpop.f32.mrf.mxu2 }
 0x306   :  { %v1387_v3 = vadd.f32 %v1386_v63, %v1184_v23  ;;  %v1416_v12 = vmax.f32 %v1412_v6, 0.0  ;;  %v3277_v23 = vld [vmem:[#allocation7 + $0x5e0] sm:$0xf]  ;;  %v3255_v63 = vld [vmem:[#allocation7 + $0x5b8] sm:$0xf0] }
 0x307   :  { %v1360_v2 = vpop.f32.mrf.mxu0  ;;  %v1402_v15 = vpop.f32.mrf.mxu3  ;;  %v3278_v26 = vor.u32 %v3705_v24, %v3277_v23  ;;  %1928 = vmatpush.bf16.msra.mxu3 %v3274_v40  ;;  %v3258_v0 = vor.u32 %v3698_v61, %v3255_v63  ;;  %v3239_v23 = vld [vmem:[#allocation7 + $0x598] sm:$0xf0]  ;;  %v3343_v40 = vld [vmem:[#allocation7 + $0x668] sm:$0xf0] }
 0x308   :  { %v1361_v4 = vadd.f32 %v1360_v2, %v1172_v53  ;;  %v1401_v8 = vadd.f32 %v1400_v62, %v1387_v3  ;;  %v3181_v53 = vld [vmem:[#allocation7 + $0x520] sm:$0xf]  ;;  %v3254_v62 = vor.u32 %v3699_v60, %v3253_v59  ;;  %v3679_v2 = vld [vmem:[#allocation7 + $0x514] sm:$0xf0]  ;;  %v3678_v3 = vld [vmem:[#allocation7 + $0x514] sm:$0xf] }
 0x309   :  { %1899 = vmatpush.bf16.msra.mxu1 %v3278_v26  ;;  %v3182_v56 = vor.u32 %v3681_v54, %v3181_v53  ;;  %v3693_v26 = vld [vmem:[#allocation7 + $0x584] sm:$0xf0]  ;;  %v3335_v53 = vld [vmem:[#allocation7 + $0x658] sm:$0xf0] }
 0x30a   :  { %v1375_v7 = vadd.f32 %v1374_v5, %v1361_v4  ;;  %v1413_v16 = vadd.f32 %v1409_v9, %v1401_v8  ;;  %v3175_v5 = vld [vmem:[#allocation7 + $0x518] sm:$0xf0]  ;;  %v3697_v8 = vld [vmem:[#allocation7 + $0x5a4] sm:$0xf0]  ;;  %v3230_v28 = vor.u32 %v3693_v26, %v3229_v25  ;;  %v3327_v26 = vld [vmem:[#allocation7 + $0x648] sm:$0xf0] }
 0x30b   :  { %1929 = vmatpush.bf16.msra.mxu3 %v3266_v52  ;;  %1889 = vmatpush.bf16.msra.mxu0 %v3182_v56  ;;  %v3178_v6 = vor.u32 %v3678_v3, %v3175_v5  ;;  %v3718_v52 = vld [vmem:[#allocation7 + $0x654] sm:$0xf]  ;;  %v1456_v56 = vld [vmem:[#allocation8 + $0xa] sm:$0x3] }
 0x30c   :  { %v1414_v10 = vadd.f32 %v1408_v1, %v1375_v7  ;;  %v1417_v20 = vmax.f32 %v1413_v16, 0.0  ;;  %v3173_v1 = vld [vmem:[#allocation7 + $0x510] sm:$0xf]  ;;  %v3245_v7 = vld [vmem:[#allocation7 + $0x5a0] sm:$0xf]  ;;  %v3338_v55 = vor.u32 %v3718_v52, %v3335_v53  ;;  %v1458_v59 = vperm.slane %v1456_v56, 0 }
 0x30d   :  { %v1388_v11 = vpop.f32.mrf.mxu2  ;;  %1900 = vmatpush.bf16.msra.mxu1 %v3270_v37  ;;  %v3174_v4 = vor.u32 %v3679_v2, %v3173_v1  ;;  %v3721_v37 = vld [vmem:[#allocation7 + $0x664] sm:$0xf0]  ;;  %v3381_v52 = vld [vmem:[#allocation7 + $0x6b0] sm:$0xf]  ;;  %v3731_v53 = vld [vmem:[#allocation7 + $0x6b4] sm:$0xf0] }
 0x30e   :  { %v1418_v13 = vmax.f32 %v1414_v10, 0.0  ;;  %v1389_v14 = vadd.f32 %v1388_v11, %v1186_v43  ;;  %v3682_v43 = vld [vmem:[#allocation7 + $0x534] sm:$0xf]  ;;  %v3246_v10 = vor.u32 %v3697_v8, %v3245_v7  ;;  %v3247_v11 = vld [vmem:[#allocation7 + $0x5a8] sm:$0xf0]  ;;  %v3342_v42 = vor.u32 %v3721_v37, %v3341_v36 }
 0x30f   :  { %v3194_v46 = vor.u32 %v3682_v43, %v3191_v45  ;;  %1930 = vmatpush.bf16.msra.mxu3 %v3258_v0  ;;  %1890 = vmatpush.bf16.msra.mxu0 %v3174_v4  ;;  %v3739_v43 = vld [vmem:[#allocation7 + $0x6f4] sm:$0xf0]  ;;  %v3415_v45 = vld [vmem:[#allocation7 + $0x6f8] sm:$0xf0]  ;;  %v1459_v0 = vperm.slane %v1456_v56, 1 }
 0x310   :  { %v1420_v17 = vpack.c.bf16 %v1418_v13, %v1416_v12  ;;  %v1403_v18 = vadd.f32 %v1402_v15, %v1389_v14  ;;  %v3165_v13 = vld [vmem:[#allocation7 + $0x500] sm:$0xf]  ;;  %v3677_v14 = vld [vmem:[#allocation7 + $0x504] sm:$0xf0]  ;;  %v3676_v15 = vld [vmem:[#allocation7 + $0x504] sm:$0xf]  ;;  %v3414_v47 = vor.u32 %v3739_v43, %v3413_v41  ;;  %v3418_v48 = vor.u32 %v3738_v44, %v3415_v45 }
 0x311   :  { %1916 = vmatpush.bf16.msra.mxu2 %v3194_v46  ;;  %1901 = vmatpush.bf16.msra.mxu1 %v3262_v49  ;;  %v3166_v16 = vor.u32 %v3677_v14, %v3165_v13  ;;  %v3346_v46 = vor.u32 %v3720_v39, %v3343_v40  ;;  %v3333_v49 = vld [vmem:[#allocation7 + $0x650] sm:$0xf]  ;;  %v3714_v36 = vld [vmem:[#allocation7 + $0x634] sm:$0xf]  ;;  %v3389_v40 = vld [vmem:[#allocation7 + $0x6c0] sm:$0xf] }
 0x312   :  { %v1415_v19 = vadd.f32 %v1409_v9, %v1403_v18  ;;  %1630 = vmatmul.bf16.vlgmr.msrb.gmra.mxu0 %v1420_v17  ;;  %1658 = vmatmul.bf16.vlgmr.msrb.gmra.mxu2 %v1420_v17  ;;  %v3696_v9 = vld [vmem:[#allocation7 + $0x5a4] sm:$0xf]  ;;  %v3167_v17 = vld [vmem:[#allocation7 + $0x508] sm:$0xf0]  ;;  %v3334_v54 = vor.u32 %v3719_v50, %v3333_v49  ;;  %v3733_v41 = vld [vmem:[#allocation7 + $0x6c4] sm:$0xf0] }
 0x313   :  { %v3250_v12 = vor.u32 %v3696_v9, %v3247_v11  ;;  %v3170_v18 = vor.u32 %v3676_v15, %v3167_v17  ;;  %1891 = vmatpush.bf16.msra.mxu0 %v3166_v16  ;;  %v3405_v16 = vld [vmem:[#allocation7 + $0x6e0] sm:$0xf]  ;;  %v3737_v17 = vld [vmem:[#allocation7 + $0x6e4] sm:$0xf0]  ;;  %v3732_v43 = vld [vmem:[#allocation7 + $0x6c4] sm:$0xf] }
 0x314   :  { %v1419_v21 = vmax.f32 %v1415_v19, 0.0  ;;  %v3237_v19 = vld [vmem:[#allocation7 + $0x590] sm:$0xf]  ;;  %v3391_v44 = vld [vmem:[#allocation7 + $0x6c8] sm:$0xf0] }
 0x315   :  { %1917 = vmatpush.bf16.msra.mxu2 %v3186_v58  ;;  %1902 = vmatpush.bf16.msra.mxu1 %v3254_v62  ;;  %v3394_v45 = vor.u32 %v3732_v43, %v3391_v44  ;;  %v3311_v50 = vld [vmem:[#allocation7 + $0x628] sm:$0xf0]  ;;  %v3383_v56 = vld [vmem:[#allocation7 + $0x6b8] sm:$0xf0] }
 0x316   :  { %v1421_v22 = vpack.c.bf16 %v1419_v21, %v1417_v20  ;;  %1931 = vmatpush.bf16.msra.mxu3 %v3250_v12  ;;  %v3695_v20 = vld [vmem:[#allocation7 + $0x594] sm:$0xf0]  ;;  %v3694_v21 = vld [vmem:[#allocation7 + $0x594] sm:$0xf] }
 0x317   :  { %v3242_v24 = vor.u32 %v3694_v21, %v3239_v23  ;;  %2146 = vmatpush.bf16.msrb.mxu0 %v3350_v34  ;;  %v3717_v23 = vld [vmem:[#allocation7 + $0x644] sm:$0xf0]  ;;  %v3317_v34 = vld [vmem:[#allocation7 + $0x630] sm:$0xf] }
 0x318   :  { %1644 = vmatmul.bf16.vlgmr.msrb.gmra.mxu1 %v1421_v22  ;;  %1672 = vmatmul.bf16.vlgmr.msrb.gmra.mxu3 %v1421_v22  ;;  %v3238_v22 = vor.u32 %v3695_v20, %v3237_v19  ;;  %v3406_v19 = vor.u32 %v3737_v17, %v3405_v16  ;;  %v3407_v20 = vld [vmem:[#allocation7 + $0x6e8] sm:$0xf0]  ;;  %v3318_v37 = vor.u32 %v3715_v35, %v3317_v34  ;;  %v3367_v16 = vld [vmem:[#allocation7 + $0x698] sm:$0xf0] }
 0x319   :  { %1918 = vmatpush.bf16.msra.mxu2 %v3178_v6  ;;  %1903 = vmatpush.bf16.msra.mxu1 %v3246_v10 }
 0x31a   :  { %1932 = vmatpush.bf16.msra.mxu3 %v3242_v24  ;;  %v3716_v24 = vld [vmem:[#allocation7 + $0x644] sm:$0xf] }
 0x31b   :  { %2147 = vmatpush.bf16.msrb.mxu0 %v3342_v42  ;;  %v3330_v29 = vor.u32 %v3716_v24, %v3327_v26  ;;  %v3390_v42 = vor.u32 %v3733_v41, %v3389_v40  ;;  %v3747_v24 = vld [vmem:[#allocation10 + $0x38] sm:$0xff]  ;;  %v3746_v26 = vld [vmem:[#allocation10 + $0x30] sm:$0xff] }
 0x31d   :  { %1919 = vmatpush.bf16.msra.mxu2 %v3170_v18  ;;  %1904 = vmatpush.bf16.msra.mxu1 %v3238_v22  ;;  %v3736_v18 = vld [vmem:[#allocation7 + $0x6e4] sm:$0xf]  ;;  %v3325_v22 = vld [vmem:[#allocation7 + $0x640] sm:$0xf] }
 0x31e   :  { %1933 = vmatpush.bf16.msra.mxu3 %v3234_v30  ;;  %v3410_v21 = vor.u32 %v3736_v18, %v3407_v20  ;;  %v3326_v25 = vor.u32 %v3717_v23, %v3325_v22  ;;  %v3357_v18 = vld [vmem:[#allocation7 + $0x680] sm:$0xf]  ;;  %v3724_v20 = vld [vmem:[#allocation7 + $0x684] sm:$0xf]  ;;  %v3359_v22 = vld [vmem:[#allocation7 + $0x688] sm:$0xf0] }
 0x31f   :  { %2148 = vmatpush.bf16.msrb.mxu0 %v3334_v54  ;;  %v3730_v54 = vld [vmem:[#allocation7 + $0x6b4] sm:$0xf]  ;;  %v3362_v23 = vor.u32 %v3724_v20, %v3359_v22 }
 0x321   :  { %1905 = vmatpush.bf16.msra.mxu1 %v3230_v28  ;;  %2174 = vmatpush.bf16.msrb.mxu2 %v3354_v38  ;;  %v3735_v28 = vld [vmem:[#allocation7 + $0x6d4] sm:$0xf0]  ;;  %v3319_v38 = vld [vmem:[#allocation7 + $0x638] sm:$0xf0] }
 0x322   :  { %2188 = vmatpush.bf16.msrb.mxu3 %v3418_v48  ;;  %v3398_v30 = vor.u32 %v3735_v28, %v3397_v27  ;;  %v3322_v39 = vor.u32 %v3714_v36, %v3319_v38  ;;  %v3712_v48 = vld [vmem:[#allocation7 + $0x624] sm:$0xf]  ;;  %v3745_v28 = vld [vmem:[#allocation10 + $0x28] sm:$0xff] }
 0x323   :  { %2149 = vmatpush.bf16.msrb.mxu0 %v3326_v25  ;;  %v3755_v25 = vld [vmem:[#allocation10 + $0x78] sm:$0xff] }
 0x325   :  { %2160 = vmatpush.bf16.msrb.mxu1 %v3414_v47  ;;  %2175 = vmatpush.bf16.msrb.mxu2 %v3346_v46  ;;  %v3309_v46 = vld [vmem:[#allocation7 + $0x620] sm:$0xf]  ;;  %v3713_v47 = vld [vmem:[#allocation7 + $0x624] sm:$0xf0] }
 0x326   :  { %2189 = vmatpush.bf16.msrb.mxu3 %v3410_v21  ;;  %v3310_v49 = vor.u32 %v3713_v47, %v3309_v46 }
 0x327   :  { %2150 = vmatpush.bf16.msrb.mxu0 %v3318_v37 }
 0x329   :  { %2176 = vmatpush.bf16.msrb.mxu2 %v3338_v55  ;;  %2161 = vmatpush.bf16.msrb.mxu1 %v3406_v19  ;;  %v3382_v55 = vor.u32 %v3731_v53, %v3381_v52  ;;  %v3725_v19 = vld [vmem:[#allocation7 + $0x684] sm:$0xf0]  ;;  %v3754_v53 = vld [vmem:[#allocation10 + $0x70] sm:$0xff] }
 0x32a   :  { %2190 = vmatpush.bf16.msrb.mxu3 %v3402_v33  ;;  %v3358_v21 = vor.u32 %v3725_v19, %v3357_v18 }
 0x32b   :  { %2151 = vmatpush.bf16.msrb.mxu0 %v3310_v49 }
 0x32d   :  { %2177 = vmatpush.bf16.msrb.mxu2 %v3330_v29  ;;  %2162 = vmatpush.bf16.msrb.mxu1 %v3398_v30  ;;  %v1718_v29 = vld [vmem:[#allocation8 + $0xc] sm:$0x3] }
 0x32e   :  { %2191 = vmatpush.bf16.msrb.mxu3 %v3394_v45  ;;  %v1720_v32 = vperm.slane %v1718_v29, 0  ;;  %v1721_v37 = vperm.slane %v1718_v29, 1 }
 0x331   :  { %2178 = vmatpush.bf16.msrb.mxu2 %v3322_v39  ;;  %2163 = vmatpush.bf16.msrb.mxu1 %v3390_v42 }
 0x335   :  { %2164 = vmatpush.bf16.msrb.mxu1 %v3382_v55  ;;  %v3753_v55 = vld [vmem:[#allocation10 + $0x68] sm:$0xff] }
 0x38f   :  { %v1631_v51 = vpop.f32.mrf.mxu0 }
 0x390   :  { %v1632_v61 = vadd.f32 %v1631_v51, %v1458_v59  ;;  %v3314_v51 = vor.u32 %v3712_v48, %v3311_v50 }
 0x392   :  { %2179 = vmatpush.bf16.msrb.mxu2 %v3314_v51 }
 0x395   :  { %v1645_v57 = vpop.f32.mrf.mxu1  ;;  %v1659_v58 = vpop.f32.mrf.mxu2 }
 0x396   :  { %v1646_v63 = vadd.f32 %v1645_v57, %v1632_v61  ;;  %v1660_v6 = vadd.f32 %v1659_v58, %v1459_v0  ;;  %v3386_v57 = vor.u32 %v3730_v54, %v3383_v56  ;;  %v3301_v58 = vld [vmem:[#allocation7 + $0x610] sm:$0xf]  ;;  %v3743_v56 = vld [vmem:[#allocation10 + $0x18] sm:$0xff] }
 0x397   :  { %v1633_v60 = vpop.f32.mrf.mxu0  ;;  %v3744_v54 = vld [vmem:[#allocation10 + $0x20] sm:$0xff] }
 0x398   :  { %v1634_v1 = vadd.f32 %v1633_v60, %v1458_v59  ;;  %v1678_v5 = vmax.f32 %v1646_v63, 0.0  ;;  %v3711_v59 = vld [vmem:[#allocation7 + $0x614] sm:$0xf0]  ;;  %v3710_v60 = vld [vmem:[#allocation7 + $0x614] sm:$0xf]  ;;  %2192 = vmatpush.bf16.msrb.mxu3 %v3386_v57 }
 0x399   :  { %v3302_v61 = vor.u32 %v3711_v59, %v3301_v58  ;;  %v3752_v57 = vld [vmem:[#allocation10 + $0x60] sm:$0xff]  ;;  %v3742_v58 = vld [vmem:[#allocation10 + $0x10] sm:$0xff]  ;;  %v3751_v59 = vld [vmem:[#allocation10 + $0x58] sm:$0xff] }
 0x39b   :  { %v1673_v62 = vpop.f32.mrf.mxu3  ;;  %2152 = vmatpush.bf16.msrb.mxu0 %v3302_v61  ;;  %v3750_v61 = vld [vmem:[#allocation10 + $0x50] sm:$0xff] }
 0x39c   :  { %v1674_v8 = vadd.f32 %v1673_v62, %v1660_v6  ;;  %v3303_v62 = vld [vmem:[#allocation7 + $0x618] sm:$0xf0]  ;;  %v3293_v6 = vld [vmem:[#allocation7 + $0x600] sm:$0xf] }
 0x39d   :  { %v1647_v2 = vpop.f32.mrf.mxu1  ;;  %v1661_v4 = vpop.f32.mrf.mxu2  ;;  %v3306_v63 = vor.u32 %v3710_v60, %v3303_v62  ;;  %v3741_v60 = vld [vmem:[#allocation10 + $0x8] sm:$0xff]  ;;  %v3740_v62 = vld [vmem:[#allocation10] sm:$0xff] }
 0x39e   :  { %v1648_v3 = vadd.f32 %v1647_v2, %v1634_v1  ;;  %v1662_v10 = vadd.f32 %v1661_v4, %v1459_v0  ;;  %v1679_v13 = vmax.f32 %v1674_v8, 0.0  ;;  %v3373_v0 = vld [vmem:[#allocation7 + $0x6a0] sm:$0xf]  ;;  %v3729_v1 = vld [vmem:[#allocation7 + $0x6a4] sm:$0xf0] }
 0x39f   :  { %v3728_v2 = vld [vmem:[#allocation7 + $0x6a4] sm:$0xf]  ;;  %v3375_v4 = vld [vmem:[#allocation7 + $0x6a8] sm:$0xf0]  ;;  %2180 = vmatpush.bf16.msrb.mxu2 %v3306_v63  ;;  %v3749_v63 = vld [vmem:[#allocation10 + $0x48] sm:$0xff] }
 0x3a0   :  { %v1680_v7 = vmax.f32 %v1648_v3, 0.0  ;;  %v3374_v3 = vor.u32 %v3729_v1, %v3373_v0  ;;  %v3708_v8 = vld [vmem:[#allocation7 + $0x604] sm:$0xf]  ;;  %v3748_v0 = vld [vmem:[#allocation10 + $0x40] sm:$0xff] }
 0x3a2   :  { %v1682_v9 = vpack.c.bf16 %v1680_v7, %v1678_v5  ;;  %v3378_v5 = vor.u32 %v3728_v2, %v3375_v4  ;;  %v3709_v7 = vld [vmem:[#allocation7 + $0x604] sm:$0xf0]  ;;  %2165 = vmatpush.bf16.msrb.mxu1 %v3374_v3  ;;  %v1980_v2 = vld [vmem:[#allocation8 + $0xe] sm:$0x3] }
 0x3a3   :  { %v1675_v11 = vpop.f32.mrf.mxu3 }
 0x3a4   :  { %v1676_v12 = vadd.f32 %v1675_v11, %v1662_v10  ;;  %1892 = vmatmul.bf16.vlgmr.msra.gmra.mxu0 %v1682_v9  ;;  %1920 = vmatmul.bf16.vlgmr.msra.gmra.mxu2 %v1682_v9  ;;  %v3294_v9 = vor.u32 %v3709_v7, %v3293_v6  ;;  %v3295_v10 = vld [vmem:[#allocation7 + $0x608] sm:$0xf0] }
 0x3a5   :  { %2193 = vmatpush.bf16.msrb.mxu3 %v3378_v5  ;;  %v3298_v11 = vor.u32 %v3708_v8, %v3295_v10  ;;  %v1982_v5 = vperm.slane %v1980_v2, 0  ;;  %v1983_v10 = vperm.slane %v1980_v2, 1 }
 0x3a6   :  { %v1681_v14 = vmax.f32 %v1676_v12, 0.0  ;;  %v3365_v12 = vld [vmem:[#allocation7 + $0x690] sm:$0xf]  ;;  %2153 = vmatpush.bf16.msrb.mxu0 %v3294_v9 }
 0x3a7   :  { %2181 = vmatpush.bf16.msrb.mxu2 %v3298_v11 }
 0x3a8   :  { %v1683_v15 = vpack.c.bf16 %v1681_v14, %v1679_v13  ;;  %v3727_v13 = vld [vmem:[#allocation7 + $0x694] sm:$0xf0]  ;;  %v3726_v14 = vld [vmem:[#allocation7 + $0x694] sm:$0xf] }
 0x3a9   :  { %v3370_v17 = vor.u32 %v3726_v14, %v3367_v16 }
 0x3aa   :  { %1906 = vmatmul.bf16.vlgmr.msra.gmra.mxu1 %v1683_v15  ;;  %1934 = vmatmul.bf16.vlgmr.msra.gmra.mxu3 %v1683_v15  ;;  %v3366_v15 = vor.u32 %v3727_v13, %v3365_v12 }
 0x3ab   :  { %2194 = vmatpush.bf16.msrb.mxu3 %v3370_v17  ;;  %2340 = vmatpush.bf16.msra.mxu0 %v3747_v24 }
 0x3ac   :  { %2166 = vmatpush.bf16.msrb.mxu1 %v3366_v15 }
 0x3af   :  { %2195 = vmatpush.bf16.msrb.mxu3 %v3362_v23  ;;  %2341 = vmatpush.bf16.msra.mxu0 %v3746_v26 }
 0x3b0   :  { %2167 = vmatpush.bf16.msrb.mxu1 %v3358_v21 }
 0x3b3   :  { %2342 = vmatpush.bf16.msra.mxu0 %v3745_v28 }
 0x3b4   :  { %2354 = vmatpush.bf16.msra.mxu1 %v3755_v25 }
 0x3b7   :  { %2343 = vmatpush.bf16.msra.mxu0 %v3744_v54 }
 0x3b8   :  { %2355 = vmatpush.bf16.msra.mxu1 %v3754_v53 }
 0x3bb   :  { %2344 = vmatpush.bf16.msra.mxu0 %v3743_v56 }
 0x3bc   :  { %2356 = vmatpush.bf16.msra.mxu1 %v3753_v55 }
 0x3bf   :  { %2345 = vmatpush.bf16.msra.mxu0 %v3742_v58 }
 0x3c0   :  { %2357 = vmatpush.bf16.msra.mxu1 %v3752_v57 }
 0x3c3   :  { %2346 = vmatpush.bf16.msra.mxu0 %v3741_v60 }
 0x3c4   :  { %2358 = vmatpush.bf16.msra.mxu1 %v3751_v59 }
 0x3c7   :  { %2347 = vmatpush.bf16.msra.mxu0 %v3740_v62 }
 0x3c8   :  { %2359 = vmatpush.bf16.msra.mxu1 %v3750_v61 }
 0x3cc   :  { %2360 = vmatpush.bf16.msra.mxu1 %v3749_v63 }
 0x3d0   :  { %2361 = vmatpush.bf16.msra.mxu1 %v3748_v0 }
 0x421   :  { %v1893_v27 = vpop.f32.mrf.mxu0 }
 0x422   :  { %v1894_v34 = vadd.f32 %v1893_v27, %v1720_v32  ;;  %v3768_v27 = vld [vmem:[%s4008_s5] ss:$0 sm:$0xff] }
 0x427   :  { %v1907_v30 = vpop.f32.mrf.mxu1  ;;  %v1921_v31 = vpop.f32.mrf.mxu2 }
 0x428   :  { %v1908_v36 = vadd.f32 %v1907_v30, %v1894_v34  ;;  %v1922_v43 = vadd.f32 %v1921_v31, %v1721_v37 }
 0x429   :  { %v1895_v33 = vpop.f32.mrf.mxu0 }
 0x42a   :  { %v1896_v38 = vadd.f32 %v1895_v33, %v1720_v32  ;;  %v1940_v42 = vmax.f32 %v1908_v36, 0.0 }
 0x42d   :  { %v1935_v35 = vpop.f32.mrf.mxu3 }
 0x42e   :  { %v1936_v45 = vadd.f32 %v1935_v35, %v1922_v43 }
 0x42f   :  { %v1909_v39 = vpop.f32.mrf.mxu1  ;;  %v1923_v41 = vpop.f32.mrf.mxu2 }
 0x430   :  { %v1910_v40 = vadd.f32 %v1909_v39, %v1896_v38  ;;  %v1924_v47 = vadd.f32 %v1923_v41, %v1721_v37  ;;  %v1941_v50 = vmax.f32 %v1936_v45, 0.0 }
 0x432   :  { %v1942_v44 = vmax.f32 %v1910_v40, 0.0 }
 0x434   :  { %v1944_v46 = vpack.c.bf16 %v1942_v44, %v1940_v42 }
 0x435   :  { %v1937_v48 = vpop.f32.mrf.mxu3 }
 0x436   :  { %v1938_v49 = vadd.f32 %v1937_v48, %v1924_v47  ;;  %2154 = vmatmul.bf16.vlgmr.msrb.gmra.mxu0 %v1944_v46  ;;  %2182 = vmatmul.bf16.vlgmr.msrb.gmra.mxu2 %v1944_v46 }
 0x438   :  { %v1943_v51 = vmax.f32 %v1938_v49, 0.0 }
 0x43a   :  { %v1945_v52 = vpack.c.bf16 %v1943_v51, %v1941_v50 }
 0x43c   :  { %2168 = vmatmul.bf16.vlgmr.msrb.gmra.mxu1 %v1945_v52  ;;  %2196 = vmatmul.bf16.vlgmr.msrb.gmra.mxu3 %v1945_v52 }
 0x4b3   :  { %v2155_v1 = vpop.f32.mrf.mxu0 }
 0x4b4   :  { %v2156_v7 = vadd.f32 %v2155_v1, %v1982_v5 }
 0x4b9   :  { %v2169_v3 = vpop.f32.mrf.mxu1  ;;  %v2183_v4 = vpop.f32.mrf.mxu2 }
 0x4ba   :  { %v2170_v9 = vadd.f32 %v2169_v3, %v2156_v7  ;;  %v2184_v16 = vadd.f32 %v2183_v4, %v1983_v10 }
 0x4bb   :  { %v2157_v6 = vpop.f32.mrf.mxu0 }
 0x4bc   :  { %v2158_v11 = vadd.f32 %v2157_v6, %v1982_v5  ;;  %v2202_v15 = vmax.f32 %v2170_v9, 0.0 }
 0x4bf   :  { %v2197_v8 = vpop.f32.mrf.mxu3 }
 0x4c0   :  { %v2198_v18 = vadd.f32 %v2197_v8, %v2184_v16 }
 0x4c1   :  { %v2171_v12 = vpop.f32.mrf.mxu1  ;;  %v2185_v14 = vpop.f32.mrf.mxu2 }
 0x4c2   :  { %v2172_v13 = vadd.f32 %v2171_v12, %v2158_v11  ;;  %v2186_v20 = vadd.f32 %v2185_v14, %v1983_v10  ;;  %v2203_v23 = vmax.f32 %v2198_v18, 0.0 }
 0x4c4   :  { %v2204_v17 = vmax.f32 %v2172_v13, 0.0 }
 0x4c6   :  { %v2206_v19 = vpack.c.bf16 %v2204_v17, %v2202_v15 }
 0x4c7   :  { %v2199_v21 = vpop.f32.mrf.mxu3 }
 0x4c8   :  { %v2200_v22 = vadd.f32 %v2199_v21, %v2186_v20  ;;  %2348 = vmatmul.bf16.vlgmr.msra.gmra.mxu0 %v2206_v19 }
 0x4ca   :  { %v2205_v24 = vmax.f32 %v2200_v22, 0.0 }
 0x4cc   :  { %v2207_v25 = vpack.c.bf16 %v2205_v24, %v2203_v23 }
 0x4ce   :  { %2362 = vmatmul.bf16.vlgmr.msra.gmra.mxu1 %v2207_v25 }
 0x545   :  { %v2349_v26 = vpop.f32.mrf.mxu0 }
 0x546   :  { %v2350_v28 = vadd.f32 %v3768_v27, %v2349_v26 }
 0x54b   :  { %v2363_v29 = vpop.f32.mrf.mxu1 }
 0x54c   :  { %v2364_v30 = vadd.f32 %v2363_v29, %v2350_v28 }
 0x54d   :  { %v2351_v31 = vpop.f32.mrf.mxu0 }
 0x54e   :  { %2368 = vst [vmem:[#allocation11] sm:$0xff] %v2364_v30  ;;  %v2352_v32 = vadd.f32 %v3768_v27, %v2351_v31 }
 0x553   :  { %v2365_v33 = vpop.f32.mrf.mxu1 }
 0x554   :  { %v2366_v34 = vadd.f32 %v2365_v33, %v2352_v32 }
 0x556   :  { %2369 = vst [vmem:[#allocation11 + $0x8] sm:$0xff] %v2366_v34 }
 0x557   :  { %2382 = dma.vmem_to_hbm [thread:$0]  %s2375_s26, 256, %s2377_s7, [#allocation4], %s3923_s29, %s3923_s29, %s3924_s30  }
 0x558   :  { %3920 = dma.done.wait [#allocation4], 256  }
 0x559   :  { %3921 = vsyncadd [#allocation4], 4294967040 }
 0x55a   :  { %2387 = vsyncpa [#allocation3], 1 }
 0x55b   :  { %2388 = vsyncpa [#allocation6], 1 }
 0x55c   :  { %2389 = vsyncpa [#allocation9], 1 }
 0x55d   :  { %2390 = vsyncpa [#allocation4], 1 }

</bundles_post_ra>
